<compile_context>
chip_gen: v7x
topology: tpu7x:2x2x1
jax: 0.10.0
libtpu: 0.0.40
codegen_flags: <defaults>
</compile_context>

<pallas_src>
import jax
import jax.numpy as jnp
import numpy as np
from jax.experimental import pallas as pl
from jax.experimental.pallas import tpu as pltpu


_ROW_TILE_CAP = 512       # rows (batch*node) per grid step; ~10 KiB live VMEM / row
_LANE = 128
_SUBLANE = 8


def _round_up(v, m):
    return (v + m - 1) // m * m


# ----------------------------------------------------------------------------
# Packed weight-matrix builders (run in the JAX wrapper, NOT in the kernel).
# Activations are (rows, t*C) with lane index = t*C + c (time-major), so every
# conv over time+channels is one (t_in*Cin, t_out*Cout) matmul.
# ----------------------------------------------------------------------------
def _dconv_mat(w, d, t_in):
    """Dilated causal conv taps w: (K, Cin, Cout) -> (t_in*Cin, t_out*Cout)."""
    K, Ci, Co = w.shape
    t_out = t_in - d * (K - 1)
    eye = jnp.eye(t_out, dtype=w.dtype)
    m = jnp.zeros((t_in * Ci, t_out * Co), w.dtype)
    for k in range(K):
        blk = jnp.kron(eye, w[k])                              # same-t block diag
        m = m + jnp.pad(blk, ((k * d * Ci, (t_in - t_out - k * d) * Ci), (0, 0)))
    return m


def _tconv_mat(w, d, t_in):
    """ConvTranspose2d taps w: (K, Cin, Cout) -> (t_in*Cin, (t_in+d*(K-1))*Cout).
    The transpose-conv zero padding is encoded inside the matrix; the kernel
    never builds a zero-filled LHS."""
    K, Ci, Co = w.shape
    t_new = t_in + d * (K - 1)
    eye = jnp.eye(t_in, dtype=w.dtype)
    m = jnp.zeros((t_in * Ci, t_new * Co), w.dtype)
    for k in range(K):
        blk = jnp.kron(eye, w[k])
        m = m + jnp.pad(blk, ((0, 0), (k * d * Co, (t_new - t_in - k * d) * Co)))
    return m


# ----------------------------------------------------------------------------
# Weight packing: one (8,128)-aligned slab + static (offset, rows, cols) slots
# ----------------------------------------------------------------------------
def _prepare_inputs(params, cfg, T):
    Cin, C = params['in_w'].shape
    Cs = params['stacks'][0]['layers'][0]['ws'].shape[1]
    out_ts = cfg['out_ts']
    out_ch = params['final_w'].shape[1]
    f32 = jnp.float32

    pieces = []

    def add(a):
        a = jnp.asarray(a, f32)
        if a.ndim == 1:
            a = a.reshape(1, -1)
        pieces.append(a)
        return len(pieces) - 1

    meta = dict(T=T, C=C, Cs=Cs, out_ts=out_ts, out_ch=out_ch)

    # input 1x1 conv (rows padded to the zero-padded input lane width)
    lanes_in = _round_up(T * Cin, _LANE)
    w_in = jnp.kron(jnp.eye(T, dtype=f32), params['in_w'])     # (T*Cin, T*C)
    meta['in_w'] = add(jnp.pad(w_in, ((0, lanes_in - T * Cin), (0, 0))))
    meta['in_b'] = add(jnp.tile(params['in_b'], T))

    meta['stacks'] = []
    for s, (sp, L, K) in enumerate(zip(params['stacks'], cfg['num_layers'],
                                       cfg['kernel_sizes'])):
        if L > 1:
            assert Cs == C, "chained ConvTranspose layers need skip_ch == res_ch"
        layers, t_cur = [], T
        for i in range(L):
            d = 2 ** (i + 1)
            lp = sp['layers'][i]
            t_out = t_cur - d * (K - 1)
            eye_t = jnp.eye(t_out, dtype=f32)
            layers.append(dict(
                wf=add(_dconv_mat(lp['wf'], d, t_cur)),
                bf=add(jnp.tile(lp['bf'], t_out)),
                wg=add(_dconv_mat(lp['wg'], d, t_cur)),
                bg=add(jnp.tile(lp['bg'], t_out)),
                ws=add(jnp.kron(eye_t, lp['ws'])),
                bs=add(jnp.tile(lp['bs'], t_out)),
                wr=add(jnp.kron(eye_t, lp['wr'])),
                br=add(jnp.tile(lp['br'], t_out)),
            ))
            t_cur = t_out
        tconvs = [None] * L
        t_c = t_cur
        for i in reversed(range(L)):                           # applied order
            d = 2 ** (i + 1)
            tp = sp['tconvs'][i]
            t_new = t_c + d * (K - 1)
            tconvs[i] = dict(w=add(_tconv_mat(tp['w'], d, t_c)),
                             b=add(jnp.tile(tp['b'], t_new)))
            t_c = t_new
        # per-stack Linear(in_ts, out_ts) over the T axis with the
        # temp_stack_linear scalar weight folded in.  kron(lin_w, I_C) is
        # independent of the row tile R (the old kron(I_R, .) blow-up is gone).
        sw = params['stack_w'][s]
        meta['stacks'].append(dict(
            K=K, L=L, layers=layers, tconvs=tconvs,
            lin_w=add(sw * jnp.kron(sp['lin_w'], jnp.eye(C, dtype=f32))),
            lin_b=add(sw * jnp.repeat(sp['lin_b'], C))))

    # final channel linear; temp_stack_linear bias folded into its bias.
    # Output columns are zero-padded to a multiple of 128 lanes so the kernel's
    # stores are unmasked, lane-dense vst's.
    lanes_out = _round_up(out_ts * out_ch, _LANE)
    w_fin = jnp.kron(jnp.eye(out_ts, dtype=f32), params['final_w'])
    fb = params['final_b'] + params['stack_b'] * jnp.sum(params['final_w'], axis=0)
    meta['fin_w'] = add(jnp.pad(w_fin, ((0, 0), (0, lanes_out - out_ts * out_ch))))
    meta['fin_b'] = add(jnp.pad(jnp.tile(fb, out_ts),
                                (0, lanes_out - out_ts * out_ch)))
    meta['lanes_in'] = lanes_in
    meta['lanes_out'] = lanes_out

    # ---- pack everything into one slab: row offsets 8-aligned, width 128-k ----
    slab_w = _round_up(max(p.shape[1] for p in pieces), _LANE)
    slots, chunks, off = [], [], 0
    for p in pieces:
        r, c = p.shape
        rp = _round_up(r, _SUBLANE)
        chunks.append(jnp.pad(p, ((0, rp - r), (0, slab_w - c))))
        slots.append((off, r, c))
        off += rp
    slab = jnp.concatenate(chunks, axis=0)
    return slab, slots, meta


# ----------------------------------------------------------------------------
# Fused kernel
# ----------------------------------------------------------------------------
def _make_kernel(meta, slots, mxu_dtype):
    T, C, Cs = meta['T'], meta['C'], meta['Cs']

    def kernel(x_ref, w_ref, o_ref):
        def mat(j):                          # tile-aligned static ref slice
            off, r, c = slots[j]
            return w_ref[off:off + r, 0:c]

        def bias(j):                         # (1, c) row, broadcasts over rows
            off, _, c = slots[j]
            return w_ref[off:off + 1, 0:c]

        def mm(a, j):
            # MXU matmul; operands optionally bf16, accumulation always f32.
            return jnp.dot(a.astype(mxu_dtype), mat(j).astype(mxu_dtype),
                           preferred_element_type=jnp.float32)

        x = x_ref[...]                                        # (R, lanes_in)
        act = mm(x, meta['in_w']) + bias(meta['in_b'])        # (R, T*C)

        total = None
        for st in meta['stacks']:
            K, L = st['K'], st['L']
            res, t_cur = act, T
            prev_skip, t_skip = None, 0

            # ---- DilatedCausalConv2d layers ----
            for i in range(L):
                d = 2 ** (i + 1)
                lp = st['layers'][i]
                t_out = t_cur - d * (K - 1)
                f = jnp.tanh(mm(res, lp['wf']) + bias(lp['bf']))
                g = mm(res, lp['wg']) + bias(lp['bg'])
                g = 0.5 * jnp.tanh(0.5 * g) + 0.5             # sigmoid, 1 EUP op
                gfo = f * g                                    # (R, t_out*C) f32
                skip = mm(gfo, lp['ws']) + bias(lp['bs'])      # (R, t_out*Cs)
                if prev_skip is not None:                      # causal tail (lane slice)
                    skip = skip + prev_skip[:, (t_skip - t_out) * Cs:]
                res = (mm(gfo, lp['wr']) + bias(lp['br'])
                       + res[:, d * (K - 1) * C:])             # residual tail
                prev_skip, t_skip, t_cur = skip, t_out, t_out

            # ---- ConvTranspose2d chain (reversed); padding lives in weights ----
            cur = prev_skip
            for i in reversed(range(L)):
                tc = st['tconvs'][i]
                cur = mm(cur, tc['w']) + bias(tc['b'])

            # ---- per-stack T-axis linear (stack scalar weight pre-folded) ----
            s_out = mm(cur, st['lin_w']) + bias(st['lin_b'])   # (R, out_ts*C)
            total = s_out if total is None else total + s_out

        # ---- final channel linear -> zero-padded lane-dense output ----
        y = mm(total, meta['fin_w']) + bias(meta['fin_b'])     # (R, lanes_out)
        o_ref[...] = y.astype(o_ref.dtype)

    return kernel


# ----------------------------------------------------------------------------
# Wrapper: layout plumbing + pallas_call
# ----------------------------------------------------------------------------
def temp_model_fwd(params, x, cfg, mxu_dtype=jnp.float32):
    """x: (B, in_ts_length, n, in_channels) -> (B, out_ts_length, n, out_channels)."""
    B, T, n, Cin = x.shape
    BN = B * n
    out_ts = cfg['out_ts']
    out_ch = params['final_w'].shape[1]

    slab, slots, meta = _prepare_inputs(params, cfg, T)
    lanes_in, lanes_out = meta['lanes_in'], meta['lanes_out']

    # rows = (batch, node); lanes = (t, channel) time-major, zero-padded to 128k.
    xs = jnp.transpose(x, (0, 2, 1, 3)).reshape(BN, T * Cin).astype(jnp.float32)
    R = min(_ROW_TILE_CAP, _round_up(BN, _SUBLANE))
    BN_pad = _round_up(BN, R)
    xs = jnp.pad(xs, ((0, BN_pad - BN), (0, lanes_in - T * Cin)))

    kernel = _make_kernel(meta, slots, mxu_dtype)
    y = pl.pallas_call(
        kernel,
        grid=(BN_pad // R,),
        in_specs=[pl.BlockSpec((R, lanes_in), lambda i: (i, 0)),
                  pl.BlockSpec(slab.shape, lambda i: (0, 0))],
        out_specs=pl.BlockSpec((R, lanes_out), lambda i: (i, 0)),
        out_shape=jax.ShapeDtypeStruct((BN_pad, lanes_out), jnp.float32),
        compiler_params=pltpu.CompilerParams(
            dimension_semantics=("parallel",),
            vmem_limit_bytes=32 * 1024 * 1024),
    )(xs, slab)

    # strip padding, back to PyTorch output layout (B, out_ts, n, out_channels)
    y = y[:BN, :out_ts * out_ch].reshape(B, n, out_ts, out_ch)
    return jnp.transpose(y, (0, 2, 1, 3))


# ----------------------------------------------------------------------------
# Deterministic parameter init (module __init__ shapes, synthetic values)
# ----------------------------------------------------------------------------
def init_params(key, cfg):
    C = cfg['res_ch']          # temp_in_residual_channels == temp_out_residual_channels
    Cs = cfg['skip_ch']        # temp_out_skip_channels
    Cin = cfg['in_channels']
    keys = iter(jax.random.split(key, 256))

    def nrm(shape, scale=0.3):
        return (scale * jax.random.normal(next(keys), shape)).astype(jnp.float32)

    params = dict(
        in_w=nrm((Cin, C)), in_b=nrm((C,)),
        stacks=[],
        stack_w=nrm((len(cfg['kernel_sizes']),)), stack_b=nrm(()),
        final_w=nrm((C, cfg['out_channels'])), final_b=nrm((cfg['out_channels'],)),
    )
    for L, K in zip(cfg['num_layers'], cfg['kernel_sizes']):
        layers, tconvs = [], []
        for _ in range(L):
            layers.append(dict(
                wf=nrm((K, C, C)), bf=nrm((C,)),
                wg=nrm((K, C, C)), bg=nrm((C,)),
                ws=nrm((C, Cs)), bs=nrm((Cs,)),
                wr=nrm((C, C)), br=nrm((C,)),
            ))
            tconvs.append(dict(w=nrm((K, Cs, C)), b=nrm((C,))))
        params['stacks'].append(dict(
            layers=layers, tconvs=tconvs,
            lin_w=nrm((cfg['in_ts'], cfg['out_ts'])), lin_b=nrm((cfg['out_ts'],))))
    return params


# ----------------------------------------------------------------------------
# Pure-JAX reference (direct conv / conv-transpose definitions) for validation
# ----------------------------------------------------------------------------
def _ref_dconv(x, w, b, d):
    K = w.shape[0]
    T_out = x.shape[2] - d * (K - 1)
    out = b
    for k in range(K):
        out = out + jnp.einsum('bntc,co->bnto', x[:, :, k * d:k * d + T_out, :], w[k])
    return out


def _ref_tconv(x, w, b, d):
    K = w.shape[0]
    T = x.shape[2]
    out = jnp.zeros(x.shape[:2] + (T + d * (K - 1), w.shape[2]), x.dtype) + b
    for k in range(K):
        out = out.at[:, :, k * d:k * d + T, :].add(jnp.einsum('bntc,co->bnto', x, w[k]))
    return out


def _ref_model(params, x, cfg):
    xk = jnp.transpose(x, (0, 2, 1, 3))
    temp_in = jnp.einsum('bntc,co->bnto', xk, params['in_w']) + params['in_b']
    outs = []
    for sp, L, K in zip(params['stacks'], cfg['num_layers'], cfg['kernel_sizes']):
        res, prev_skip = temp_in, None
        for i in range(L):
            d = 2 ** (i + 1)
            lp = sp['layers'][i]
            f = jnp.tanh(_ref_dconv(res, lp['wf'], lp['bf'], d))
            g = jax.nn.sigmoid(_ref_dconv(res, lp['wg'], lp['bg'], d))
            gfo = f * g
            skip = jnp.einsum('bntc,co->bnto', gfo, lp['ws']) + lp['bs']
            if prev_skip is not None:
                skip = skip + prev_skip[:, :, -skip.shape[2]:, :]
            r = jnp.einsum('bntc,co->bnto', gfo, lp['wr']) + lp['br']
            res = r + res[:, :, d * (K - 1):, :]
            prev_skip = skip
        for i in reversed(range(L)):
            d = 2 ** (i + 1)
            prev_skip = _ref_tconv(prev_skip, sp['tconvs'][i]['w'],
                                   sp['tconvs'][i]['b'], d)
        y = (jnp.einsum('bntc,to->bnoc', prev_skip, sp['lin_w'])
             + sp['lin_b'][None, None, :, None])
        outs.append(y)
    out = sum(o * params['stack_w'][i] for i, o in enumerate(outs)) + params['stack_b']
    y = jnp.einsum('bntc,co->bnto', out, params['final_w']) + params['final_b']
    return jnp.transpose(y, (0, 2, 1, 3))


# ----------------------------------------------------------------------------
if __name__ == "__main__":
    cfg = dict(in_ts=16, out_ts=8,
               num_layers=(2, 1), kernel_sizes=(2, 3),
               in_channels=3, out_channels=2,
               res_ch=8, skip_ch=8)
    key = jax.random.PRNGKey(0)
    pkey, xkey = jax.random.split(key)
    params = init_params(pkey, cfg)

    B, n = 2, 4
    x = jax.random.normal(xkey, (B, cfg['in_ts'], n, cfg['in_channels']), jnp.float32)

    y_ref = np.asarray(_ref_model(params, x, cfg))

    # exact path (f32 MXU operands)
    fwd32 = jax.jit(lambda p, xx: temp_model_fwd(p, xx, cfg, jnp.float32))
    y32 = jax.block_until_ready(fwd32(params, x))
    assert y32.shape == (B, cfg['out_ts'], n, cfg['out_channels']), y32.shape
    assert np.all(np.isfinite(np.asarray(y32)))
    np.testing.assert_allclose(np.asarray(y32), y_ref, rtol=2e-2, atol=2e-2)

    # bf16-operand MXU fast path (v6e/v7x); accumulation + elementwise stay f32
    fwd16 = jax.jit(lambda p, xx: temp_model_fwd(p, xx, cfg, jnp.bfloat16))
    y16 = jax.block_until_ready(fwd16(params, x))
    assert np.all(np.isfinite(np.asarray(y16)))
    np.testing.assert_allclose(np.asarray(y16), y_ref, rtol=6e-2, atol=6e-2)

    print("KERNEL_OK")
</pallas_src>

<mosaic_0001>
module attributes {stable_mosaic.version = 11 : i64} {
  func.func @kernel(%arg0: i32, %arg1: memref<8x128xf32, #tpu.memory_space<vmem>>, %arg2: memref<2200x128xf32, #tpu.memory_space<vmem>>, %arg3: memref<8x128xf32, #tpu.memory_space<vmem>>) attributes {dimension_semantics = [#tpu.dimension_semantics<parallel>], iteration_bounds = array<i64: 1>, scalar_prefetch = 0 : i64, scratch_operands = 0 : i64, tpu.core_type = #tpu.core_type<tc>, window_params = [{transform_indices = @transform_0, window_bounds = array<i64: 8, 128>}, {pipeline_mode = #tpu.pipeline_mode<synchronous>, transform_indices = @transform_1, window_bounds = array<i64: 2200, 128>}, {transform_indices = @transform_2, window_bounds = array<i64: 8, 128>}]} {
    %c0 = arith.constant 0 : index
    %c0_0 = arith.constant 0 : index
    %0 = vector.load %arg1[%c0, %c0_0] : memref<8x128xf32, #tpu.memory_space<vmem>>, vector<8x128xf32>
    %c0_1 = arith.constant 0 : index
    %c0_2 = arith.constant 0 : index
    %1 = vector.load %arg2[%c0_1, %c0_2] : memref<2200x128xf32, #tpu.memory_space<vmem>>, vector<128x128xf32>
    %cst = arith.constant dense<0.000000e+00> : vector<8x128xf32>
    %2 = tpu.matmul %0, %1, %cst {dimension_numbers = #tpu.dot_dimension_numbers<[1], [0], [0], [1], [0, 0, 1, 1], [], []>} : vector<8x128xf32>, vector<128x128xf32>, vector<8x128xf32> -> vector<8x128xf32>
    %c128 = arith.constant 128 : index
    %c0_3 = arith.constant 0 : index
    %3 = vector.load %arg2[%c128, %c0_3] : memref<2200x128xf32, #tpu.memory_space<vmem>>, vector<1x128xf32>
    %4 = vector.broadcast %3 : vector<1x128xf32> to vector<8x128xf32>
    %5 = arith.addf %2, %4 : vector<8x128xf32>
    %c136 = arith.constant 136 : index
    %c0_4 = arith.constant 0 : index
    %6 = vector.load %arg2[%c136, %c0_4] : memref<2200x128xf32, #tpu.memory_space<vmem>>, vector<128x112xf32>
    %cst_5 = arith.constant dense<0.000000e+00> : vector<8x112xf32>
    %7 = tpu.matmul %5, %6, %cst_5 {dimension_numbers = #tpu.dot_dimension_numbers<[1], [0], [0], [1], [0, 0, 1, 1], [], []>} : vector<8x128xf32>, vector<128x112xf32>, vector<8x112xf32> -> vector<8x112xf32>
    %c264 = arith.constant 264 : index
    %c0_6 = arith.constant 0 : index
    %8 = vector.load %arg2[%c264, %c0_6] : memref<2200x128xf32, #tpu.memory_space<vmem>>, vector<1x112xf32>
    %9 = vector.broadcast %8 : vector<1x112xf32> to vector<8x112xf32>
    %10 = arith.addf %7, %9 : vector<8x112xf32>
    %11 = math.tanh %10 : vector<8x112xf32>
    %c272 = arith.constant 272 : index
    %c0_7 = arith.constant 0 : index
    %12 = vector.load %arg2[%c272, %c0_7] : memref<2200x128xf32, #tpu.memory_space<vmem>>, vector<128x112xf32>
    %cst_8 = arith.constant dense<0.000000e+00> : vector<8x112xf32>
    %13 = tpu.matmul %5, %12, %cst_8 {dimension_numbers = #tpu.dot_dimension_numbers<[1], [0], [0], [1], [0, 0, 1, 1], [], []>} : vector<8x128xf32>, vector<128x112xf32>, vector<8x112xf32> -> vector<8x112xf32>
    %c400 = arith.constant 400 : index
    %c0_9 = arith.constant 0 : index
    %14 = vector.load %arg2[%c400, %c0_9] : memref<2200x128xf32, #tpu.memory_space<vmem>>, vector<1x112xf32>
    %15 = vector.broadcast %14 : vector<1x112xf32> to vector<8x112xf32>
    %16 = arith.addf %13, %15 : vector<8x112xf32>
    %cst_10 = arith.constant 5.000000e-01 : f32
    %17 = vector.broadcast %cst_10 : f32 to vector<8x112xf32>
    %18 = arith.mulf %17, %16 : vector<8x112xf32>
    %19 = math.tanh %18 : vector<8x112xf32>
    %cst_11 = arith.constant 5.000000e-01 : f32
    %20 = vector.broadcast %cst_11 : f32 to vector<8x112xf32>
    %21 = arith.mulf %20, %19 : vector<8x112xf32>
    %cst_12 = arith.constant 5.000000e-01 : f32
    %22 = vector.broadcast %cst_12 : f32 to vector<8x112xf32>
    %23 = arith.addf %21, %22 : vector<8x112xf32>
    %24 = arith.mulf %11, %23 : vector<8x112xf32>
    %c408 = arith.constant 408 : index
    %c0_13 = arith.constant 0 : index
    %25 = vector.load %arg2[%c408, %c0_13] : memref<2200x128xf32, #tpu.memory_space<vmem>>, vector<112x112xf32>
    %cst_14 = arith.constant dense<0.000000e+00> : vector<8x112xf32>
    %26 = tpu.matmul %24, %25, %cst_14 {dimension_numbers = #tpu.dot_dimension_numbers<[1], [0], [0], [1], [0, 0, 1, 1], [], []>} : vector<8x112xf32>, vector<112x112xf32>, vector<8x112xf32> -> vector<8x112xf32>
    %c520 = arith.constant 520 : index
    %c0_15 = arith.constant 0 : index
    %27 = vector.load %arg2[%c520, %c0_15] : memref<2200x128xf32, #tpu.memory_space<vmem>>, vector<1x112xf32>
    %28 = vector.broadcast %27 : vector<1x112xf32> to vector<8x112xf32>
    %29 = arith.addf %26, %28 : vector<8x112xf32>
    %c528 = arith.constant 528 : index
    %c0_16 = arith.constant 0 : index
    %30 = vector.load %arg2[%c528, %c0_16] : memref<2200x128xf32, #tpu.memory_space<vmem>>, vector<112x112xf32>
    %cst_17 = arith.constant dense<0.000000e+00> : vector<8x112xf32>
    %31 = tpu.matmul %24, %30, %cst_17 {dimension_numbers = #tpu.dot_dimension_numbers<[1], [0], [0], [1], [0, 0, 1, 1], [], []>} : vector<8x112xf32>, vector<112x112xf32>, vector<8x112xf32> -> vector<8x112xf32>
    %c640 = arith.constant 640 : index
    %c0_18 = arith.constant 0 : index
    %32 = vector.load %arg2[%c640, %c0_18] : memref<2200x128xf32, #tpu.memory_space<vmem>>, vector<1x112xf32>
    %33 = vector.broadcast %32 : vector<1x112xf32> to vector<8x112xf32>
    %34 = arith.addf %31, %33 : vector<8x112xf32>
    %35 = vector.extract_strided_slice %5 {offsets = [0, 16], sizes = [8, 112], strides = [1, 1]} : vector<8x128xf32> to vector<8x112xf32>
    %36 = arith.addf %34, %35 : vector<8x112xf32>
    %c648 = arith.constant 648 : index
    %c0_19 = arith.constant 0 : index
    %37 = vector.load %arg2[%c648, %c0_19] : memref<2200x128xf32, #tpu.memory_space<vmem>>, vector<112x80xf32>
    %cst_20 = arith.constant dense<0.000000e+00> : vector<8x80xf32>
    %38 = tpu.matmul %36, %37, %cst_20 {dimension_numbers = #tpu.dot_dimension_numbers<[1], [0], [0], [1], [0, 0, 1, 1], [], []>} : vector<8x112xf32>, vector<112x80xf32>, vector<8x80xf32> -> vector<8x80xf32>
    %c760 = arith.constant 760 : index
    %c0_21 = arith.constant 0 : index
    %39 = vector.load %arg2[%c760, %c0_21] : memref<2200x128xf32, #tpu.memory_space<vmem>>, vector<1x80xf32>
    %40 = vector.broadcast %39 : vector<1x80xf32> to vector<8x80xf32>
    %41 = arith.addf %38, %40 : vector<8x80xf32>
    %42 = math.tanh %41 : vector<8x80xf32>
    %c768 = arith.constant 768 : index
    %c0_22 = arith.constant 0 : index
    %43 = vector.load %arg2[%c768, %c0_22] : memref<2200x128xf32, #tpu.memory_space<vmem>>, vector<112x80xf32>
    %cst_23 = arith.constant dense<0.000000e+00> : vector<8x80xf32>
    %44 = tpu.matmul %36, %43, %cst_23 {dimension_numbers = #tpu.dot_dimension_numbers<[1], [0], [0], [1], [0, 0, 1, 1], [], []>} : vector<8x112xf32>, vector<112x80xf32>, vector<8x80xf32> -> vector<8x80xf32>
    %c880 = arith.constant 880 : index
    %c0_24 = arith.constant 0 : index
    %45 = vector.load %arg2[%c880, %c0_24] : memref<2200x128xf32, #tpu.memory_space<vmem>>, vector<1x80xf32>
    %46 = vector.broadcast %45 : vector<1x80xf32> to vector<8x80xf32>
    %47 = arith.addf %44, %46 : vector<8x80xf32>
    %cst_25 = arith.constant 5.000000e-01 : f32
    %48 = vector.broadcast %cst_25 : f32 to vector<8x80xf32>
    %49 = arith.mulf %48, %47 : vector<8x80xf32>
    %50 = math.tanh %49 : vector<8x80xf32>
    %cst_26 = arith.constant 5.000000e-01 : f32
    %51 = vector.broadcast %cst_26 : f32 to vector<8x80xf32>
    %52 = arith.mulf %51, %50 : vector<8x80xf32>
    %cst_27 = arith.constant 5.000000e-01 : f32
    %53 = vector.broadcast %cst_27 : f32 to vector<8x80xf32>
    %54 = arith.addf %52, %53 : vector<8x80xf32>
    %55 = arith.mulf %42, %54 : vector<8x80xf32>
    %c888 = arith.constant 888 : index
    %c0_28 = arith.constant 0 : index
    %56 = vector.load %arg2[%c888, %c0_28] : memref<2200x128xf32, #tpu.memory_space<vmem>>, vector<80x80xf32>
    %cst_29 = arith.constant dense<0.000000e+00> : vector<8x80xf32>
    %57 = tpu.matmul %55, %56, %cst_29 {dimension_numbers = #tpu.dot_dimension_numbers<[1], [0], [0], [1], [0, 0, 1, 1], [], []>} : vector<8x80xf32>, vector<80x80xf32>, vector<8x80xf32> -> vector<8x80xf32>
    %c968 = arith.constant 968 : index
    %c0_30 = arith.constant 0 : index
    %58 = vector.load %arg2[%c968, %c0_30] : memref<2200x128xf32, #tpu.memory_space<vmem>>, vector<1x80xf32>
    %59 = vector.broadcast %58 : vector<1x80xf32> to vector<8x80xf32>
    %60 = arith.addf %57, %59 : vector<8x80xf32>
    %61 = vector.extract_strided_slice %29 {offsets = [0, 32], sizes = [8, 80], strides = [1, 1]} : vector<8x112xf32> to vector<8x80xf32>
    %62 = arith.addf %60, %61 : vector<8x80xf32>
    %c1064 = arith.constant 1064 : index
    %c0_31 = arith.constant 0 : index
    %63 = vector.load %arg2[%c1064, %c0_31] : memref<2200x128xf32, #tpu.memory_space<vmem>>, vector<80x112xf32>
    %cst_32 = arith.constant dense<0.000000e+00> : vector<8x112xf32>
    %64 = tpu.matmul %62, %63, %cst_32 {dimension_numbers = #tpu.dot_dimension_numbers<[1], [0], [0], [1], [0, 0, 1, 1], [], []>} : vector<8x80xf32>, vector<80x112xf32>, vector<8x112xf32> -> vector<8x112xf32>
    %c1144 = arith.constant 1144 : index
    %c0_33 = arith.constant 0 : index
    %65 = vector.load %arg2[%c1144, %c0_33] : memref<2200x128xf32, #tpu.memory_space<vmem>>, vector<1x112xf32>
    %66 = vector.broadcast %65 : vector<1x112xf32> to vector<8x112xf32>
    %67 = arith.addf %64, %66 : vector<8x112xf32>
    %c1152 = arith.constant 1152 : index
    %c0_34 = arith.constant 0 : index
    %68 = vector.load %arg2[%c1152, %c0_34] : memref<2200x128xf32, #tpu.memory_space<vmem>>, vector<112x128xf32>
    %cst_35 = arith.constant dense<0.000000e+00> : vector<8x128xf32>
    %69 = tpu.matmul %67, %68, %cst_35 {dimension_numbers = #tpu.dot_dimension_numbers<[1], [0], [0], [1], [0, 0, 1, 1], [], []>} : vector<8x112xf32>, vector<112x128xf32>, vector<8x128xf32> -> vector<8x128xf32>
    %c1264 = arith.constant 1264 : index
    %c0_36 = arith.constant 0 : index
    %70 = vector.load %arg2[%c1264, %c0_36] : memref<2200x128xf32, #tpu.memory_space<vmem>>, vector<1x128xf32>
    %71 = vector.broadcast %70 : vector<1x128xf32> to vector<8x128xf32>
    %72 = arith.addf %69, %71 : vector<8x128xf32>
    %c1272 = arith.constant 1272 : index
    %c0_37 = arith.constant 0 : index
    %73 = vector.load %arg2[%c1272, %c0_37] : memref<2200x128xf32, #tpu.memory_space<vmem>>, vector<128x64xf32>
    %cst_38 = arith.constant dense<0.000000e+00> : vector<8x64xf32>
    %74 = tpu.matmul %72, %73, %cst_38 {dimension_numbers = #tpu.dot_dimension_numbers<[1], [0], [0], [1], [0, 0, 1, 1], [], []>} : vector<8x128xf32>, vector<128x64xf32>, vector<8x64xf32> -> vector<8x64xf32>
    %c1400 = arith.constant 1400 : index
    %c0_39 = arith.constant 0 : index
    %75 = vector.load %arg2[%c1400, %c0_39] : memref<2200x128xf32, #tpu.memory_space<vmem>>, vector<1x64xf32>
    %76 = vector.broadcast %75 : vector<1x64xf32> to vector<8x64xf32>
    %77 = arith.addf %74, %76 : vector<8x64xf32>
    %c1408 = arith.constant 1408 : index
    %c0_40 = arith.constant 0 : index
    %78 = vector.load %arg2[%c1408, %c0_40] : memref<2200x128xf32, #tpu.memory_space<vmem>>, vector<128x96xf32>
    %cst_41 = arith.constant dense<0.000000e+00> : vector<8x96xf32>
    %79 = tpu.matmul %5, %78, %cst_41 {dimension_numbers = #tpu.dot_dimension_numbers<[1], [0], [0], [1], [0, 0, 1, 1], [], []>} : vector<8x128xf32>, vector<128x96xf32>, vector<8x96xf32> -> vector<8x96xf32>
    %c1536 = arith.constant 1536 : index
    %c0_42 = arith.constant 0 : index
    %80 = vector.load %arg2[%c1536, %c0_42] : memref<2200x128xf32, #tpu.memory_space<vmem>>, vector<1x96xf32>
    %81 = vector.broadcast %80 : vector<1x96xf32> to vector<8x96xf32>
    %82 = arith.addf %79, %81 : vector<8x96xf32>
    %83 = math.tanh %82 : vector<8x96xf32>
    %c1544 = arith.constant 1544 : index
    %c0_43 = arith.constant 0 : index
    %84 = vector.load %arg2[%c1544, %c0_43] : memref<2200x128xf32, #tpu.memory_space<vmem>>, vector<128x96xf32>
    %cst_44 = arith.constant dense<0.000000e+00> : vector<8x96xf32>
    %85 = tpu.matmul %5, %84, %cst_44 {dimension_numbers = #tpu.dot_dimension_numbers<[1], [0], [0], [1], [0, 0, 1, 1], [], []>} : vector<8x128xf32>, vector<128x96xf32>, vector<8x96xf32> -> vector<8x96xf32>
    %c1672 = arith.constant 1672 : index
    %c0_45 = arith.constant 0 : index
    %86 = vector.load %arg2[%c1672, %c0_45] : memref<2200x128xf32, #tpu.memory_space<vmem>>, vector<1x96xf32>
    %87 = vector.broadcast %86 : vector<1x96xf32> to vector<8x96xf32>
    %88 = arith.addf %85, %87 : vector<8x96xf32>
    %cst_46 = arith.constant 5.000000e-01 : f32
    %89 = vector.broadcast %cst_46 : f32 to vector<8x96xf32>
    %90 = arith.mulf %89, %88 : vector<8x96xf32>
    %91 = math.tanh %90 : vector<8x96xf32>
    %cst_47 = arith.constant 5.000000e-01 : f32
    %92 = vector.broadcast %cst_47 : f32 to vector<8x96xf32>
    %93 = arith.mulf %92, %91 : vector<8x96xf32>
    %cst_48 = arith.constant 5.000000e-01 : f32
    %94 = vector.broadcast %cst_48 : f32 to vector<8x96xf32>
    %95 = arith.addf %93, %94 : vector<8x96xf32>
    %96 = arith.mulf %83, %95 : vector<8x96xf32>
    %c1680 = arith.constant 1680 : index
    %c0_49 = arith.constant 0 : index
    %97 = vector.load %arg2[%c1680, %c0_49] : memref<2200x128xf32, #tpu.memory_space<vmem>>, vector<96x96xf32>
    %cst_50 = arith.constant dense<0.000000e+00> : vector<8x96xf32>
    %98 = tpu.matmul %96, %97, %cst_50 {dimension_numbers = #tpu.dot_dimension_numbers<[1], [0], [0], [1], [0, 0, 1, 1], [], []>} : vector<8x96xf32>, vector<96x96xf32>, vector<8x96xf32> -> vector<8x96xf32>
    %c1776 = arith.constant 1776 : index
    %c0_51 = arith.constant 0 : index
    %99 = vector.load %arg2[%c1776, %c0_51] : memref<2200x128xf32, #tpu.memory_space<vmem>>, vector<1x96xf32>
    %100 = vector.broadcast %99 : vector<1x96xf32> to vector<8x96xf32>
    %101 = arith.addf %98, %100 : vector<8x96xf32>
    %c1888 = arith.constant 1888 : index
    %c0_52 = arith.constant 0 : index
    %102 = vector.load %arg2[%c1888, %c0_52] : memref<2200x128xf32, #tpu.memory_space<vmem>>, vector<96x128xf32>
    %cst_53 = arith.constant dense<0.000000e+00> : vector<8x128xf32>
    %103 = tpu.matmul %101, %102, %cst_53 {dimension_numbers = #tpu.dot_dimension_numbers<[1], [0], [0], [1], [0, 0, 1, 1], [], []>} : vector<8x96xf32>, vector<96x128xf32>, vector<8x128xf32> -> vector<8x128xf32>
    %c1984 = arith.constant 1984 : index
    %c0_54 = arith.constant 0 : index
    %104 = vector.load %arg2[%c1984, %c0_54] : memref<2200x128xf32, #tpu.memory_space<vmem>>, vector<1x128xf32>
    %105 = vector.broadcast %104 : vector<1x128xf32> to vector<8x128xf32>
    %106 = arith.addf %103, %105 : vector<8x128xf32>
    %c1992 = arith.constant 1992 : index
    %c0_55 = arith.constant 0 : index
    %107 = vector.load %arg2[%c1992, %c0_55] : memref<2200x128xf32, #tpu.memory_space<vmem>>, vector<128x64xf32>
    %cst_56 = arith.constant dense<0.000000e+00> : vector<8x64xf32>
    %108 = tpu.matmul %106, %107, %cst_56 {dimension_numbers = #tpu.dot_dimension_numbers<[1], [0], [0], [1], [0, 0, 1, 1], [], []>} : vector<8x128xf32>, vector<128x64xf32>, vector<8x64xf32> -> vector<8x64xf32>
    %c2120 = arith.constant 2120 : index
    %c0_57 = arith.constant 0 : index
    %109 = vector.load %arg2[%c2120, %c0_57] : memref<2200x128xf32, #tpu.memory_space<vmem>>, vector<1x64xf32>
    %110 = vector.broadcast %109 : vector<1x64xf32> to vector<8x64xf32>
    %111 = arith.addf %108, %110 : vector<8x64xf32>
    %112 = arith.addf %77, %111 : vector<8x64xf32>
    %c2128 = arith.constant 2128 : index
    %c0_58 = arith.constant 0 : index
    %113 = vector.load %arg2[%c2128, %c0_58] : memref<2200x128xf32, #tpu.memory_space<vmem>>, vector<64x128xf32>
    %cst_59 = arith.constant dense<0.000000e+00> : vector<8x128xf32>
    %114 = tpu.matmul %112, %113, %cst_59 {dimension_numbers = #tpu.dot_dimension_numbers<[1], [0], [0], [1], [0, 0, 1, 1], [], []>} : vector<8x64xf32>, vector<64x128xf32>, vector<8x128xf32> -> vector<8x128xf32>
    %c2192 = arith.constant 2192 : index
    %c0_60 = arith.constant 0 : index
    %115 = vector.load %arg2[%c2192, %c0_60] : memref<2200x128xf32, #tpu.memory_space<vmem>>, vector<1x128xf32>
    %116 = vector.broadcast %115 : vector<1x128xf32> to vector<8x128xf32>
    %117 = arith.addf %114, %116 : vector<8x128xf32>
    %c0_61 = arith.constant 0 : index
    %c0_62 = arith.constant 0 : index
    %118 = vector.load %arg3[%c0_61, %c0_62] : memref<8x128xf32, #tpu.memory_space<vmem>>, vector<8x128xf32>
    tpu.vector_store %arg3[%c0_61, %c0_62], %117 {strides = array<i32>} : memref<8x128xf32, #tpu.memory_space<vmem>>, vector<8x128xf32>,
    return
  }
  func.func @transform_0(%arg0: i32) -> (i32, i32) {
    %c0_i32 = arith.constant 0 : i32
    %c0_i32_0 = arith.constant 0 : i32
    return %arg0, %c0_i32 : i32, i32
  }
  func.func @transform_1(%arg0: i32) -> (i32, i32) {
    %c0_i32 = arith.constant 0 : i32
    %c0_i32_0 = arith.constant 0 : i32
    %c0_i32_1 = arith.constant 0 : i32
    return %c0_i32, %c0_i32_0 : i32, i32
  }
  func.func @transform_2(%arg0: i32) -> (i32, i32) {
    %c0_i32 = arith.constant 0 : i32
    %c0_i32_0 = arith.constant 0 : i32
    return %arg0, %c0_i32 : i32, i32
  }
}

</mosaic_0001>

<bundles_post_ra>
// kernel: tile.168
= control target key start
LH: loop header
LB: loop body
LE: loop exit
PB: predicated region body
PF: predicated region fallthrough
CT: control target
= control target key end

     0   :  { %s22_s0 = inlined_call_operand.vmem [shape: f32[2], index: 0, kind: input, shape index: {}]   ;;  %s23_s1 = inlined_call_operand.vmem [shape: f32[8,2], index: 1, kind: output, shape index: {}]  }
   0x1   :  { %v4_v0 = vld [vmem:[%s22_s0] ss:$0 sm:$0xff] }
   0x2   :  { %5 = vst [vmem:[%s23_s1] sm:$0xff] %v4_v0 }

// kernel: tile.169
= control target key start
LH: loop header
LB: loop body
LE: loop exit
PB: predicated region body
PF: predicated region fallthrough
CT: control target
= control target key end

     0   :  { %s67_s10 = smov 14   ;;  %s68_s11 = smov 10   ;;  %vm3_vm0 = vcmask 15360   ;;  %vm9_vm1 = vcmask 130160   ;;  %vm15_vm2 = vcmask 113760   ;;  %vm21_vm3 = vcmask 97360   ;;  %s111_s0 = inlined_call_operand.vmem [shape: f32[8,2], index: 0, kind: input, shape index: {}]   ;;  %s112_s1 = inlined_call_operand.vmem [shape: f32[16], index: 1, kind: output, shape index: {}]  }
   0x1   :  { %v53_v0 = vld [vmem:[%s111_s0 + $0x7] sm:$0x1]   ;;  %v55_v1 = vld [vmem:[%s111_s0 + $0x5] sm:$0x1]   ;;  %v54_v2 = vld [vmem:[%s111_s0 + $0x6] sm:$0x1]  }
   0x2   :  { %7 = vrot.lane.b32.xlu0 %v53_v0, %s67_s10  ;;  %19 = vrot.lane.b32.xlu1 %v55_v1, %s68_s11  ;;  %v56_v3 = vld [vmem:[%s111_s0 + $0x4] sm:$0x1]   ;;  %v2_v4 = vld [vmem:[%s111_s0] sm:$0x1]   ;;  %s69_s18 = smov 12   ;;  %s70_s19 = smov 8  }
   0x3   :  { %4 = vst.msk [vmem:[#allocation0] sm:$0x1] %vm3_vm0, %v2_v4   ;;  %v57_v5 = vld [vmem:[%s111_s0 + $0x3] sm:$0x1]   ;;  %v58_v6 = vld [vmem:[%s111_s0 + $0x2] sm:$0x1]  }
   0x4   :  { %s71_s24 = smov 6   ;;  %s72_s25 = smov 4   ;;  %v59_v7 = vld [vmem:[%s111_s0 + $0x1] sm:$0x1]   ;;  %vm27_vm4 = vcmask 80960   ;;  %vm33_vm5 = vcmask 64560  }
   0x5   :  { %s73_s0 = smov 2   ;;  %vm39_vm6 = vcmask 48160   ;;  %vm45_vm7 = vcmask 31760  }
   0x6   :  { %13 = vrot.lane.b32.xlu0 %v54_v2, %s69_s18  ;;  %25 = vrot.lane.b32.xlu1 %v56_v3, %s70_s19 }
   0xa   :  { %31 = vrot.lane.b32.xlu0 %v57_v5, %s71_s24  ;;  %37 = vrot.lane.b32.xlu1 %v58_v6, %s72_s25 }
   0xe   :  { %43 = vrot.lane.b32.xlu0 %v59_v7, %s73_s0 }
  0x74   :  { %v8_v8 = vpop.permute.xlu0 %7   ;;  %v20_v9 = vpop.permute.xlu1 %19  }
  0x75   :  { %10 = vst.msk [vmem:[#allocation0] sm:$0x1] %vm9_vm1, %v8_v8  }
  0x78   :  { %v14_v10 = vpop.permute.xlu0 %13   ;;  %v26_v11 = vpop.permute.xlu1 %25  }
  0x79   :  { %16 = vst.msk [vmem:[#allocation0] sm:$0x1] %vm15_vm2, %v14_v10  }
  0x7a   :  { %22 = vst.msk [vmem:[#allocation0] sm:$0x1] %vm21_vm3, %v20_v9  }
  0x7b   :  { %28 = vst.msk [vmem:[#allocation0] sm:$0x1] %vm27_vm4, %v26_v11  }
  0x7c   :  { %v32_v12 = vpop.permute.xlu0 %31   ;;  %v38_v13 = vpop.permute.xlu1 %37  }
  0x7d   :  { %34 = vst.msk [vmem:[#allocation0] sm:$0x1] %vm33_vm5, %v32_v12  }
  0x7e   :  { %40 = vst.msk [vmem:[#allocation0] sm:$0x1] %vm39_vm6, %v38_v13  }
  0x80   :  { %v44_v14 = vpop.permute.xlu0 %43  }
  0x81   :  { %46 = vst.msk [vmem:[#allocation0] sm:$0x1] %vm45_vm7, %v44_v14  }
  0x88   :  { %v50_v15 = vld [vmem:[#allocation0] sm:$0x1] }
  0x89   :  { %52 = vst [vmem:[%s112_s1] sm:$0x1] %v50_v15 }

// kernel: tile.88
= control target key start
LH: loop header
LB: loop body
LE: loop exit
PB: predicated region body
PF: predicated region fallthrough
CT: control target
= control target key end

     0   :  { %2 = vsyncpa [#allocation1], 0  ;;  %s47_s6 = smov [#allocation0]   ;;  %s76_s0 = inlined_call_operand.hbm [shape: f32[8], index: 0, kind: input, shape index: {}]   ;;  %s77_s1 = inlined_call_operand.vmem [shape: f32[16,8], index: 1, kind: output, shape index: {}]  }
   0x1   :  { %s9_s7 = sshll.u32 %s47_s6, 4  ;;  %s23_s10 = scalar_lea.hbm %s76_s0, 16  ;;  %s10_s7 = int_to_ptr.vmem [resolvable:$true] %s9_s7 }
   0x2   :  { %p24_p0 = scmp.ne.s32.totalorder %s76_s0, %s23_s10  ;;  %p27_p1 = scmp.lt.u32.totalorder %s23_s10, %s76_s0 }
   0x4   :  { %p29_p2 = pnand %p27_p1, %p24_p0 }
   0x6   :  { %32 = shalt.err (!%p29_p2)
}
   0x7   :  { %s33_s15 = scalar_lea.vmem %s10_s7, 16  ;;  %s37_s16 = scalar_lea.vmem %s10_s7, 32 }
   0x8   :  { %p34_p3 = scmp.ne.s32.totalorder %s10_s7, %s33_s15  ;;  %p38_p4 = scmp.lt.s32.totalorder %s10_s7, %s10_s7 }
   0x9   :  { %p39_p5 = scmp.lt.s32.totalorder %s37_s16, %s33_s15 }
   0xb   :  { %p40_p6 = por %p39_p5, %p38_p4 }
   0xd   :  { %p41_p7 = pnand %p40_p6, %p34_p3 }
   0xf   :  { %44 = shalt.err (!%p41_p7)
}
  0x10   :  { %12 = dma.hbm_to_vmem [thread:$0]  %s76_s0, 16, %s10_s7, [#allocation1]  }
  0x11   :  { %45 = dma.done.wait [#allocation1], 16  }
  0x12   :  { %46 = vsyncadd [#allocation1], 4294967280  ;;  %v16_v0 = vld [vmem:[#allocation0] ss:$0 sm:$0xff] }
  0x13   :  { %17 = vst [vmem:[%s77_s1] sm:$0xff] %v16_v0  ;;  %21 = vst [vmem:[%s77_s1 + $0x8] sm:$0xff] %v16_v0 }
  0x14   :  { %20 = vsyncpa [#allocation1], 1 }

// kernel: tile.93
= control target key start
LH: loop header
LB: loop body
LE: loop exit
PB: predicated region body
PF: predicated region fallthrough
CT: control target
= control target key end

     0   :  { %2 = vsyncpa [#allocation1], 0  ;;  %s47_s6 = smov [#allocation0]   ;;  %s76_s0 = inlined_call_operand.hbm [shape: f32[8], index: 0, kind: input, shape index: {}]   ;;  %s77_s1 = inlined_call_operand.vmem [shape: f32[14,8], index: 1, kind: output, shape index: {}]  }
   0x1   :  { %s9_s7 = sshll.u32 %s47_s6, 4  ;;  %s23_s10 = scalar_lea.hbm %s76_s0, 16  ;;  %s10_s7 = int_to_ptr.vmem [resolvable:$true] %s9_s7 }
   0x2   :  { %p24_p0 = scmp.ne.s32.totalorder %s76_s0, %s23_s10  ;;  %p27_p1 = scmp.lt.u32.totalorder %s23_s10, %s76_s0 }
   0x4   :  { %p29_p2 = pnand %p27_p1, %p24_p0 }
   0x6   :  { %32 = shalt.err (!%p29_p2)
}
   0x7   :  { %s33_s15 = scalar_lea.vmem %s10_s7, 16  ;;  %s37_s16 = scalar_lea.vmem %s10_s7, 32 }
   0x8   :  { %p34_p3 = scmp.ne.s32.totalorder %s10_s7, %s33_s15  ;;  %p38_p4 = scmp.lt.s32.totalorder %s10_s7, %s10_s7 }
   0x9   :  { %p39_p5 = scmp.lt.s32.totalorder %s37_s16, %s33_s15 }
   0xb   :  { %p40_p6 = por %p39_p5, %p38_p4 }
   0xd   :  { %p41_p7 = pnand %p40_p6, %p34_p3 }
   0xf   :  { %44 = shalt.err (!%p41_p7)
}
  0x10   :  { %12 = dma.hbm_to_vmem [thread:$0]  %s76_s0, 16, %s10_s7, [#allocation1]  }
  0x11   :  { %45 = dma.done.wait [#allocation1], 16  }
  0x12   :  { %46 = vsyncadd [#allocation1], 4294967280  ;;  %v16_v0 = vld [vmem:[#allocation0] ss:$0 sm:$0xff] }
  0x13   :  { %17 = vst [vmem:[%s77_s1] sm:$0xff] %v16_v0  ;;  %21 = vst [vmem:[%s77_s1 + $0x8] sm:$0xff] %v16_v0 }
  0x14   :  { %20 = vsyncpa [#allocation1], 1 }

// kernel: tile.94
= control target key start
LH: loop header
LB: loop body
LE: loop exit
PB: predicated region body
PF: predicated region fallthrough
CT: control target
= control target key end

     0   :  { %s115_s10 = smov 104   ;;  %s116_s11 = smov 88   ;;  %vm3_vm0 = vcmask 64512   ;;  %vm9_vm1 = vcmask 917312   ;;  %vm15_vm2 = vcmask 851712   ;;  %vm21_vm3 = vcmask 786112   ;;  %s183_s0 = inlined_call_operand.vmem [shape: f32[14,8], index: 0, kind: input, shape index: {}]   ;;  %s184_s1 = inlined_call_operand.vmem [shape: f32[1,112], index: 1, kind: output, shape index: {}]  }
   0x1   :  { %v89_v0 = vld [vmem:[%s183_s0 + $0xd] sm:$0x1]   ;;  %v91_v1 = vld [vmem:[%s183_s0 + $0xb] sm:$0x1]   ;;  %v90_v2 = vld [vmem:[%s183_s0 + $0xc] sm:$0x1]  }
   0x2   :  { %7 = vrot.lane.b32.xlu0 %v89_v0, %s115_s10  ;;  %19 = vrot.lane.b32.xlu1 %v91_v1, %s116_s11  ;;  %v92_v3 = vld [vmem:[%s183_s0 + $0xa] sm:$0x1]   ;;  %s117_s16 = smov 96   ;;  %s118_s17 = smov 80   ;;  %v93_v4 = vld [vmem:[%s183_s0 + $0x9] sm:$0x1]  }
   0x3   :  { %v94_v5 = vld [vmem:[%s183_s0 + $0x8] sm:$0x1]   ;;  %v2_v6 = vld [vmem:[%s183_s0] sm:$0x1]   ;;  %s119_s24 = smov 72   ;;  %s120_s25 = smov 64  }
   0x4   :  { %4 = vst.msk [vmem:[#allocation0] sm:$0x1] %vm3_vm0, %v2_v6   ;;  %v95_v7 = vld [vmem:[%s183_s0 + $0x7] sm:$0x1]   ;;  %v96_v8 = vld [vmem:[%s183_s0 + $0x6] sm:$0x1]  }
   0x5   :  { %s121_s30 = smov 56   ;;  %s122_s2 = smov 48   ;;  %v97_v9 = vld [vmem:[%s183_s0 + $0x5] sm:$0x1]   ;;  %v98_v10 = vld [vmem:[%s183_s0 + $0x4] sm:$0x1]  }
   0x6   :  { %13 = vrot.lane.b32.xlu0 %v90_v2, %s117_s16  ;;  %25 = vrot.lane.b32.xlu1 %v92_v3, %s118_s17  ;;  %s123_s7 = smov 40   ;;  %s124_s8 = smov 32   ;;  %v99_v11 = vld [vmem:[%s183_s0 + $0x3] sm:$0x1]   ;;  %v100_v12 = vld [vmem:[%s183_s0 + $0x2] sm:$0x1]  }
   0x7   :  { %s125_s13 = smov 24   ;;  %s126_s14 = smov 16   ;;  %v101_v13 = vld [vmem:[%s183_s0 + $0x1] sm:$0x1]   ;;  %vm27_vm4 = vcmask 720512   ;;  %vm33_vm5 = vcmask 654912  }
   0x8   :  { %s127_s0 = smov 8   ;;  %vm39_vm6 = vcmask 589312   ;;  %vm45_vm7 = vcmask 523712   ;;  %vm51_vm8 = vcmask 458112   ;;  %vm57_vm9 = vcmask 392512  }
   0x9   :  { %vm63_vm10 = vcmask 326912   ;;  %vm69_vm11 = vcmask 261312   ;;  %vm75_vm12 = vcmask 195712   ;;  %vm81_vm13 = vcmask 130112  }
   0xa   :  { %31 = vrot.lane.b32.xlu0 %v93_v4, %s119_s24  ;;  %37 = vrot.lane.b32.xlu1 %v94_v5, %s120_s25 }
   0xe   :  { %43 = vrot.lane.b32.xlu0 %v95_v7, %s121_s30  ;;  %49 = vrot.lane.b32.xlu1 %v96_v8, %s122_s2 }
  0x12   :  { %55 = vrot.lane.b32.xlu0 %v97_v9, %s123_s7  ;;  %61 = vrot.lane.b32.xlu1 %v98_v10, %s124_s8 }
  0x16   :  { %67 = vrot.lane.b32.xlu0 %v99_v11, %s125_s13  ;;  %73 = vrot.lane.b32.xlu1 %v100_v12, %s126_s14 }
  0x1a   :  { %79 = vrot.lane.b32.xlu0 %v101_v13, %s127_s0 }
  0x74   :  { %v8_v14 = vpop.permute.xlu0 %7   ;;  %v20_v15 = vpop.permute.xlu1 %19  }
  0x75   :  { %10 = vst.msk [vmem:[#allocation0] sm:$0x1] %vm9_vm1, %v8_v14  }
  0x78   :  { %v14_v16 = vpop.permute.xlu0 %13   ;;  %v26_v17 = vpop.permute.xlu1 %25  }
  0x79   :  { %16 = vst.msk [vmem:[#allocation0] sm:$0x1] %vm15_vm2, %v14_v16  }
  0x7a   :  { %22 = vst.msk [vmem:[#allocation0] sm:$0x1] %vm21_vm3, %v20_v15  }
  0x7b   :  { %28 = vst.msk [vmem:[#allocation0] sm:$0x1] %vm27_vm4, %v26_v17  }
  0x7c   :  { %v32_v18 = vpop.permute.xlu0 %31   ;;  %v38_v19 = vpop.permute.xlu1 %37  }
  0x7d   :  { %34 = vst.msk [vmem:[#allocation0] sm:$0x1] %vm33_vm5, %v32_v18  }
  0x7e   :  { %40 = vst.msk [vmem:[#allocation0] sm:$0x1] %vm39_vm6, %v38_v19  }
  0x80   :  { %v44_v20 = vpop.permute.xlu0 %43   ;;  %v50_v21 = vpop.permute.xlu1 %49  }
  0x81   :  { %46 = vst.msk [vmem:[#allocation0] sm:$0x1] %vm45_vm7, %v44_v20  }
  0x82   :  { %52 = vst.msk [vmem:[#allocation0] sm:$0x1] %vm51_vm8, %v50_v21  }
  0x84   :  { %v56_v22 = vpop.permute.xlu0 %55   ;;  %v62_v23 = vpop.permute.xlu1 %61  }
  0x85   :  { %58 = vst.msk [vmem:[#allocation0] sm:$0x1] %vm57_vm9, %v56_v22  }
  0x86   :  { %64 = vst.msk [vmem:[#allocation0] sm:$0x1] %vm63_vm10, %v62_v23  }
  0x88   :  { %v68_v24 = vpop.permute.xlu0 %67   ;;  %v74_v25 = vpop.permute.xlu1 %73  }
  0x89   :  { %70 = vst.msk [vmem:[#allocation0] sm:$0x1] %vm69_vm11, %v68_v24  }
  0x8a   :  { %76 = vst.msk [vmem:[#allocation0] sm:$0x1] %vm75_vm12, %v74_v25  }
  0x8c   :  { %v80_v26 = vpop.permute.xlu0 %79  }
  0x8d   :  { %82 = vst.msk [vmem:[#allocation0] sm:$0x1] %vm81_vm13, %v80_v26  }
  0x94   :  { %v86_v27 = vld [vmem:[#allocation0] sm:$0x1] }
  0x95   :  { %88 = vst [vmem:[%s184_s1] sm:$0x1] %v86_v27 }

// kernel: tile.89
= control target key start
LH: loop header
LB: loop body
LE: loop exit
PB: predicated region body
PF: predicated region fallthrough
CT: control target
= control target key end

     0   :  { %s131_s10 = smov 120   ;;  %s132_s11 = smov 104   ;;  %vm3_vm0 = vcmask 64512   ;;  %vm9_vm1 = vcmask 1048512   ;;  %vm15_vm2 = vcmask 982912   ;;  %vm21_vm3 = vcmask 917312   ;;  %s207_s0 = inlined_call_operand.vmem [shape: f32[16,8], index: 0, kind: input, shape index: {}]   ;;  %s208_s1 = inlined_call_operand.vmem [shape: f32[1,128], index: 1, kind: output, shape index: {}]  }
   0x1   :  { %v101_v0 = vld [vmem:[%s207_s0 + $0xf] sm:$0x1]   ;;  %v103_v1 = vld [vmem:[%s207_s0 + $0xd] sm:$0x1]   ;;  %v102_v2 = vld [vmem:[%s207_s0 + $0xe] sm:$0x1]  }
   0x2   :  { %7 = vrot.lane.b32.xlu0 %v101_v0, %s131_s10  ;;  %19 = vrot.lane.b32.xlu1 %v103_v1, %s132_s11  ;;  %v104_v3 = vld [vmem:[%s207_s0 + $0xc] sm:$0x1]   ;;  %s133_s16 = smov 112   ;;  %s134_s17 = smov 96   ;;  %v105_v4 = vld [vmem:[%s207_s0 + $0xb] sm:$0x1]  }
   0x3   :  { %v106_v5 = vld [vmem:[%s207_s0 + $0xa] sm:$0x1]   ;;  %v2_v6 = vld [vmem:[%s207_s0] sm:$0x1]   ;;  %s135_s24 = smov 88   ;;  %s136_s25 = smov 80  }
   0x4   :  { %4 = vst.msk [vmem:[#allocation0] sm:$0x1] %vm3_vm0, %v2_v6   ;;  %v107_v7 = vld [vmem:[%s207_s0 + $0x9] sm:$0x1]   ;;  %v108_v8 = vld [vmem:[%s207_s0 + $0x8] sm:$0x1]  }
   0x5   :  { %s137_s30 = smov 72   ;;  %s138_s2 = smov 64   ;;  %v109_v9 = vld [vmem:[%s207_s0 + $0x7] sm:$0x1]   ;;  %v110_v10 = vld [vmem:[%s207_s0 + $0x6] sm:$0x1]  }
   0x6   :  { %13 = vrot.lane.b32.xlu0 %v102_v2, %s133_s16  ;;  %25 = vrot.lane.b32.xlu1 %v104_v3, %s134_s17  ;;  %s139_s7 = smov 56   ;;  %s140_s8 = smov 48   ;;  %v111_v11 = vld [vmem:[%s207_s0 + $0x5] sm:$0x1]   ;;  %v112_v12 = vld [vmem:[%s207_s0 + $0x4] sm:$0x1]  }
   0x7   :  { %s141_s13 = smov 40   ;;  %s142_s14 = smov 32   ;;  %v113_v13 = vld [vmem:[%s207_s0 + $0x3] sm:$0x1]   ;;  %v114_v14 = vld [vmem:[%s207_s0 + $0x2] sm:$0x1]  }
   0x8   :  { %s143_s19 = smov 24   ;;  %s144_s20 = smov 16   ;;  %v115_v15 = vld [vmem:[%s207_s0 + $0x1] sm:$0x1]   ;;  %vm27_vm4 = vcmask 851712   ;;  %vm33_vm5 = vcmask 786112  }
   0x9   :  { %s145_s0 = smov 8   ;;  %vm39_vm6 = vcmask 720512   ;;  %vm45_vm7 = vcmask 654912   ;;  %vm51_vm8 = vcmask 589312   ;;  %vm57_vm9 = vcmask 523712  }
   0xa   :  { %31 = vrot.lane.b32.xlu0 %v105_v4, %s135_s24  ;;  %37 = vrot.lane.b32.xlu1 %v106_v5, %s136_s25  ;;  %vm63_vm10 = vcmask 458112   ;;  %vm69_vm11 = vcmask 392512   ;;  %vm75_vm12 = vcmask 326912   ;;  %vm81_vm13 = vcmask 261312  }
   0xb   :  { %vm87_vm14 = vcmask 195712   ;;  %vm93_vm15 = vcmask 130112  }
   0xe   :  { %43 = vrot.lane.b32.xlu0 %v107_v7, %s137_s30  ;;  %49 = vrot.lane.b32.xlu1 %v108_v8, %s138_s2 }
  0x12   :  { %55 = vrot.lane.b32.xlu0 %v109_v9, %s139_s7  ;;  %61 = vrot.lane.b32.xlu1 %v110_v10, %s140_s8 }
  0x16   :  { %67 = vrot.lane.b32.xlu0 %v111_v11, %s141_s13  ;;  %73 = vrot.lane.b32.xlu1 %v112_v12, %s142_s14 }
  0x1a   :  { %79 = vrot.lane.b32.xlu0 %v113_v13, %s143_s19  ;;  %85 = vrot.lane.b32.xlu1 %v114_v14, %s144_s20 }
  0x1e   :  { %91 = vrot.lane.b32.xlu0 %v115_v15, %s145_s0 }
  0x74   :  { %v8_v16 = vpop.permute.xlu0 %7   ;;  %v20_v17 = vpop.permute.xlu1 %19  }
  0x75   :  { %10 = vst.msk [vmem:[#allocation0] sm:$0x1] %vm9_vm1, %v8_v16  }
  0x78   :  { %v14_v18 = vpop.permute.xlu0 %13   ;;  %v26_v19 = vpop.permute.xlu1 %25  }
  0x79   :  { %16 = vst.msk [vmem:[#allocation0] sm:$0x1] %vm15_vm2, %v14_v18  }
  0x7a   :  { %22 = vst.msk [vmem:[#allocation0] sm:$0x1] %vm21_vm3, %v20_v17  }
  0x7b   :  { %28 = vst.msk [vmem:[#allocation0] sm:$0x1] %vm27_vm4, %v26_v19  }
  0x7c   :  { %v32_v20 = vpop.permute.xlu0 %31   ;;  %v38_v21 = vpop.permute.xlu1 %37  }
  0x7d   :  { %34 = vst.msk [vmem:[#allocation0] sm:$0x1] %vm33_vm5, %v32_v20  }
  0x7e   :  { %40 = vst.msk [vmem:[#allocation0] sm:$0x1] %vm39_vm6, %v38_v21  }
  0x80   :  { %v44_v22 = vpop.permute.xlu0 %43   ;;  %v50_v23 = vpop.permute.xlu1 %49  }
  0x81   :  { %46 = vst.msk [vmem:[#allocation0] sm:$0x1] %vm45_vm7, %v44_v22  }
  0x82   :  { %52 = vst.msk [vmem:[#allocation0] sm:$0x1] %vm51_vm8, %v50_v23  }
  0x84   :  { %v56_v24 = vpop.permute.xlu0 %55   ;;  %v62_v25 = vpop.permute.xlu1 %61  }
  0x85   :  { %58 = vst.msk [vmem:[#allocation0] sm:$0x1] %vm57_vm9, %v56_v24  }
  0x86   :  { %64 = vst.msk [vmem:[#allocation0] sm:$0x1] %vm63_vm10, %v62_v25  }
  0x88   :  { %v68_v26 = vpop.permute.xlu0 %67   ;;  %v74_v27 = vpop.permute.xlu1 %73  }
  0x89   :  { %70 = vst.msk [vmem:[#allocation0] sm:$0x1] %vm69_vm11, %v68_v26  }
  0x8a   :  { %76 = vst.msk [vmem:[#allocation0] sm:$0x1] %vm75_vm12, %v74_v27  }
  0x8c   :  { %v80_v28 = vpop.permute.xlu0 %79   ;;  %v86_v29 = vpop.permute.xlu1 %85  }
  0x8d   :  { %82 = vst.msk [vmem:[#allocation0] sm:$0x1] %vm81_vm13, %v80_v28  }
  0x8e   :  { %88 = vst.msk [vmem:[#allocation0] sm:$0x1] %vm87_vm14, %v86_v29  }
  0x90   :  { %v92_v30 = vpop.permute.xlu0 %91  }
  0x91   :  { %94 = vst.msk [vmem:[#allocation0] sm:$0x1] %vm93_vm15, %v92_v30  }
  0x98   :  { %v98_v31 = vld [vmem:[#allocation0] sm:$0x1] }
  0x99   :  { %100 = vst [vmem:[%s208_s1] sm:$0x1] %v98_v31 }

// kernel: tile.113
= control target key start
LH: loop header
LB: loop body
LE: loop exit
PB: predicated region body
PF: predicated region fallthrough
CT: control target
= control target key end

     0   :  { %2 = vsyncpa [#allocation1], 0  ;;  %s47_s6 = smov [#allocation0]   ;;  %s76_s0 = inlined_call_operand.hbm [shape: f32[8], index: 0, kind: input, shape index: {}]   ;;  %s77_s1 = inlined_call_operand.vmem [shape: f32[10,8], index: 1, kind: output, shape index: {}]  }
   0x1   :  { %s9_s7 = sshll.u32 %s47_s6, 4  ;;  %s23_s10 = scalar_lea.hbm %s76_s0, 16  ;;  %s10_s7 = int_to_ptr.vmem [resolvable:$true] %s9_s7 }
   0x2   :  { %p24_p0 = scmp.ne.s32.totalorder %s76_s0, %s23_s10  ;;  %p27_p1 = scmp.lt.u32.totalorder %s23_s10, %s76_s0 }
   0x4   :  { %p29_p2 = pnand %p27_p1, %p24_p0 }
   0x6   :  { %32 = shalt.err (!%p29_p2)
}
   0x7   :  { %s33_s15 = scalar_lea.vmem %s10_s7, 16  ;;  %s37_s16 = scalar_lea.vmem %s10_s7, 32 }
   0x8   :  { %p34_p3 = scmp.ne.s32.totalorder %s10_s7, %s33_s15  ;;  %p38_p4 = scmp.lt.s32.totalorder %s10_s7, %s10_s7 }
   0x9   :  { %p39_p5 = scmp.lt.s32.totalorder %s37_s16, %s33_s15 }
   0xb   :  { %p40_p6 = por %p39_p5, %p38_p4 }
   0xd   :  { %p41_p7 = pnand %p40_p6, %p34_p3 }
   0xf   :  { %44 = shalt.err (!%p41_p7)
}
  0x10   :  { %12 = dma.hbm_to_vmem [thread:$0]  %s76_s0, 16, %s10_s7, [#allocation1]  }
  0x11   :  { %45 = dma.done.wait [#allocation1], 16  }
  0x12   :  { %46 = vsyncadd [#allocation1], 4294967280  ;;  %v16_v0 = vld [vmem:[#allocation0] ss:$0 sm:$0xff] }
  0x13   :  { %17 = vst [vmem:[%s77_s1] sm:$0xff] %v16_v0  ;;  %21 = vst [vmem:[%s77_s1 + $0x8] sm:$0xff] %v16_v0 }
  0x14   :  { %20 = vsyncpa [#allocation1], 1 }

// kernel: tile.114
= control target key start
LH: loop header
LB: loop body
LE: loop exit
PB: predicated region body
PF: predicated region fallthrough
CT: control target
= control target key end

     0   :  { %s83_s10 = smov 72   ;;  %s84_s11 = smov 56   ;;  %vm3_vm0 = vcmask 64512   ;;  %vm9_vm1 = vcmask 654912   ;;  %vm15_vm2 = vcmask 589312   ;;  %vm21_vm3 = vcmask 523712   ;;  %s135_s0 = inlined_call_operand.vmem [shape: f32[10,8], index: 0, kind: input, shape index: {}]   ;;  %s136_s1 = inlined_call_operand.vmem [shape: f32[1,80], index: 1, kind: output, shape index: {}]  }
   0x1   :  { %v65_v0 = vld [vmem:[%s135_s0 + $0x9] sm:$0x1]   ;;  %v67_v1 = vld [vmem:[%s135_s0 + $0x7] sm:$0x1]   ;;  %v66_v2 = vld [vmem:[%s135_s0 + $0x8] sm:$0x1]  }
   0x2   :  { %7 = vrot.lane.b32.xlu0 %v65_v0, %s83_s10  ;;  %19 = vrot.lane.b32.xlu1 %v67_v1, %s84_s11  ;;  %v68_v3 = vld [vmem:[%s135_s0 + $0x6] sm:$0x1]   ;;  %v2_v4 = vld [vmem:[%s135_s0] sm:$0x1]   ;;  %s85_s18 = smov 64   ;;  %s86_s19 = smov 48  }
   0x3   :  { %v69_v5 = vld [vmem:[%s135_s0 + $0x5] sm:$0x1]   ;;  %v70_v6 = vld [vmem:[%s135_s0 + $0x4] sm:$0x1]   ;;  %4 = vst.msk [vmem:[#allocation0] sm:$0x1] %vm3_vm0, %v2_v4  }
   0x4   :  { %s87_s24 = smov 40   ;;  %s88_s25 = smov 32   ;;  %v71_v7 = vld [vmem:[%s135_s0 + $0x3] sm:$0x1]   ;;  %v72_v8 = vld [vmem:[%s135_s0 + $0x2] sm:$0x1]  }
   0x5   :  { %s89_s30 = smov 24   ;;  %s90_s2 = smov 16   ;;  %v73_v9 = vld [vmem:[%s135_s0 + $0x1] sm:$0x1]   ;;  %vm27_vm4 = vcmask 458112   ;;  %vm33_vm5 = vcmask 392512  }
   0x6   :  { %13 = vrot.lane.b32.xlu0 %v66_v2, %s85_s18  ;;  %25 = vrot.lane.b32.xlu1 %v68_v3, %s86_s19  ;;  %s91_s0 = smov 8   ;;  %vm39_vm6 = vcmask 326912   ;;  %vm45_vm7 = vcmask 261312   ;;  %vm51_vm8 = vcmask 195712   ;;  %vm57_vm9 = vcmask 130112  }
   0xa   :  { %31 = vrot.lane.b32.xlu0 %v69_v5, %s87_s24  ;;  %37 = vrot.lane.b32.xlu1 %v70_v6, %s88_s25 }
   0xe   :  { %43 = vrot.lane.b32.xlu0 %v71_v7, %s89_s30  ;;  %49 = vrot.lane.b32.xlu1 %v72_v8, %s90_s2 }
  0x12   :  { %55 = vrot.lane.b32.xlu0 %v73_v9, %s91_s0 }
  0x74   :  { %v8_v10 = vpop.permute.xlu0 %7   ;;  %v20_v11 = vpop.permute.xlu1 %19  }
  0x75   :  { %10 = vst.msk [vmem:[#allocation0] sm:$0x1] %vm9_vm1, %v8_v10  }
  0x78   :  { %v14_v12 = vpop.permute.xlu0 %13   ;;  %v26_v13 = vpop.permute.xlu1 %25  }
  0x79   :  { %16 = vst.msk [vmem:[#allocation0] sm:$0x1] %vm15_vm2, %v14_v12  }
  0x7a   :  { %22 = vst.msk [vmem:[#allocation0] sm:$0x1] %vm21_vm3, %v20_v11  }
  0x7b   :  { %28 = vst.msk [vmem:[#allocation0] sm:$0x1] %vm27_vm4, %v26_v13  }
  0x7c   :  { %v32_v14 = vpop.permute.xlu0 %31   ;;  %v38_v15 = vpop.permute.xlu1 %37  }
  0x7d   :  { %34 = vst.msk [vmem:[#allocation0] sm:$0x1] %vm33_vm5, %v32_v14  }
  0x7e   :  { %40 = vst.msk [vmem:[#allocation0] sm:$0x1] %vm39_vm6, %v38_v15  }
  0x80   :  { %v44_v16 = vpop.permute.xlu0 %43   ;;  %v50_v17 = vpop.permute.xlu1 %49  }
  0x81   :  { %46 = vst.msk [vmem:[#allocation0] sm:$0x1] %vm45_vm7, %v44_v16  }
  0x82   :  { %52 = vst.msk [vmem:[#allocation0] sm:$0x1] %vm51_vm8, %v50_v17  }
  0x84   :  { %v56_v18 = vpop.permute.xlu0 %55  }
  0x85   :  { %58 = vst.msk [vmem:[#allocation0] sm:$0x1] %vm57_vm9, %v56_v18  }
  0x8c   :  { %v62_v19 = vld [vmem:[#allocation0] sm:$0x1] }
  0x8d   :  { %64 = vst [vmem:[%s136_s1] sm:$0x1] %v62_v19 }

// kernel: tile.143
= control target key start
LH: loop header
LB: loop body
LE: loop exit
PB: predicated region body
PF: predicated region fallthrough
CT: control target
= control target key end

     0   :  { %2 = vsyncpa [#allocation1], 0  ;;  %s47_s6 = smov [#allocation0]   ;;  %s76_s0 = inlined_call_operand.hbm [shape: f32[8], index: 0, kind: input, shape index: {}]   ;;  %s77_s1 = inlined_call_operand.vmem [shape: f32[12,8], index: 1, kind: output, shape index: {}]  }
   0x1   :  { %s9_s7 = sshll.u32 %s47_s6, 4  ;;  %s23_s10 = scalar_lea.hbm %s76_s0, 16  ;;  %s10_s7 = int_to_ptr.vmem [resolvable:$true] %s9_s7 }
   0x2   :  { %p24_p0 = scmp.ne.s32.totalorder %s76_s0, %s23_s10  ;;  %p27_p1 = scmp.lt.u32.totalorder %s23_s10, %s76_s0 }
   0x4   :  { %p29_p2 = pnand %p27_p1, %p24_p0 }
   0x6   :  { %32 = shalt.err (!%p29_p2)
}
   0x7   :  { %s33_s15 = scalar_lea.vmem %s10_s7, 16  ;;  %s37_s16 = scalar_lea.vmem %s10_s7, 32 }
   0x8   :  { %p34_p3 = scmp.ne.s32.totalorder %s10_s7, %s33_s15  ;;  %p38_p4 = scmp.lt.s32.totalorder %s10_s7, %s10_s7 }
   0x9   :  { %p39_p5 = scmp.lt.s32.totalorder %s37_s16, %s33_s15 }
   0xb   :  { %p40_p6 = por %p39_p5, %p38_p4 }
   0xd   :  { %p41_p7 = pnand %p40_p6, %p34_p3 }
   0xf   :  { %44 = shalt.err (!%p41_p7)
}
  0x10   :  { %12 = dma.hbm_to_vmem [thread:$0]  %s76_s0, 16, %s10_s7, [#allocation1]  }
  0x11   :  { %45 = dma.done.wait [#allocation1], 16  }
  0x12   :  { %46 = vsyncadd [#allocation1], 4294967280  ;;  %v16_v0 = vld [vmem:[#allocation0] ss:$0 sm:$0xff] }
  0x13   :  { %17 = vst [vmem:[%s77_s1] sm:$0xff] %v16_v0  ;;  %21 = vst [vmem:[%s77_s1 + $0x8] sm:$0xff] %v16_v0 }
  0x14   :  { %20 = vsyncpa [#allocation1], 1 }

// kernel: tile.144
= control target key start
LH: loop header
LB: loop body
LE: loop exit
PB: predicated region body
PF: predicated region fallthrough
CT: control target
= control target key end

     0   :  { %s99_s10 = smov 88   ;;  %s100_s11 = smov 72   ;;  %vm3_vm0 = vcmask 64512   ;;  %vm9_vm1 = vcmask 786112   ;;  %vm15_vm2 = vcmask 720512   ;;  %vm21_vm3 = vcmask 654912   ;;  %s159_s0 = inlined_call_operand.vmem [shape: f32[12,8], index: 0, kind: input, shape index: {}]   ;;  %s160_s1 = inlined_call_operand.vmem [shape: f32[1,96], index: 1, kind: output, shape index: {}]  }
   0x1   :  { %v77_v0 = vld [vmem:[%s159_s0 + $0xb] sm:$0x1]   ;;  %v79_v1 = vld [vmem:[%s159_s0 + $0x9] sm:$0x1]   ;;  %v78_v2 = vld [vmem:[%s159_s0 + $0xa] sm:$0x1]  }
   0x2   :  { %7 = vrot.lane.b32.xlu0 %v77_v0, %s99_s10  ;;  %19 = vrot.lane.b32.xlu1 %v79_v1, %s100_s11  ;;  %v80_v3 = vld [vmem:[%s159_s0 + $0x8] sm:$0x1]   ;;  %s101_s16 = smov 80   ;;  %s102_s17 = smov 64   ;;  %v81_v4 = vld [vmem:[%s159_s0 + $0x7] sm:$0x1]  }
   0x3   :  { %v2_v5 = vld [vmem:[%s159_s0] sm:$0x1]   ;;  %v82_v6 = vld [vmem:[%s159_s0 + $0x6] sm:$0x1]   ;;  %s103_s24 = smov 56   ;;  %s104_s25 = smov 48  }
   0x4   :  { %4 = vst.msk [vmem:[#allocation0] sm:$0x1] %vm3_vm0, %v2_v5   ;;  %v83_v7 = vld [vmem:[%s159_s0 + $0x5] sm:$0x1]   ;;  %v84_v8 = vld [vmem:[%s159_s0 + $0x4] sm:$0x1]  }
   0x5   :  { %s105_s30 = smov 40   ;;  %s106_s2 = smov 32   ;;  %v85_v9 = vld [vmem:[%s159_s0 + $0x3] sm:$0x1]   ;;  %v86_v10 = vld [vmem:[%s159_s0 + $0x2] sm:$0x1]  }
   0x6   :  { %13 = vrot.lane.b32.xlu0 %v78_v2, %s101_s16  ;;  %25 = vrot.lane.b32.xlu1 %v80_v3, %s102_s17  ;;  %s107_s7 = smov 24   ;;  %s108_s8 = smov 16   ;;  %v87_v11 = vld [vmem:[%s159_s0 + $0x1] sm:$0x1]   ;;  %vm27_vm4 = vcmask 589312   ;;  %vm33_vm5 = vcmask 523712  }
   0x7   :  { %s109_s0 = smov 8   ;;  %vm39_vm6 = vcmask 458112   ;;  %vm45_vm7 = vcmask 392512   ;;  %vm51_vm8 = vcmask 326912   ;;  %vm57_vm9 = vcmask 261312  }
   0x8   :  { %vm63_vm10 = vcmask 195712   ;;  %vm69_vm11 = vcmask 130112  }
   0xa   :  { %31 = vrot.lane.b32.xlu0 %v81_v4, %s103_s24  ;;  %37 = vrot.lane.b32.xlu1 %v82_v6, %s104_s25 }
   0xe   :  { %43 = vrot.lane.b32.xlu0 %v83_v7, %s105_s30  ;;  %49 = vrot.lane.b32.xlu1 %v84_v8, %s106_s2 }
  0x12   :  { %55 = vrot.lane.b32.xlu0 %v85_v9, %s107_s7  ;;  %61 = vrot.lane.b32.xlu1 %v86_v10, %s108_s8 }
  0x16   :  { %67 = vrot.lane.b32.xlu0 %v87_v11, %s109_s0 }
  0x74   :  { %v8_v12 = vpop.permute.xlu0 %7   ;;  %v20_v13 = vpop.permute.xlu1 %19  }
  0x75   :  { %10 = vst.msk [vmem:[#allocation0] sm:$0x1] %vm9_vm1, %v8_v12  }
  0x78   :  { %v14_v14 = vpop.permute.xlu0 %13   ;;  %v26_v15 = vpop.permute.xlu1 %25  }
  0x79   :  { %16 = vst.msk [vmem:[#allocation0] sm:$0x1] %vm15_vm2, %v14_v14  }
  0x7a   :  { %22 = vst.msk [vmem:[#allocation0] sm:$0x1] %vm21_vm3, %v20_v13  }
  0x7b   :  { %28 = vst.msk [vmem:[#allocation0] sm:$0x1] %vm27_vm4, %v26_v15  }
  0x7c   :  { %v32_v16 = vpop.permute.xlu0 %31   ;;  %v38_v17 = vpop.permute.xlu1 %37  }
  0x7d   :  { %34 = vst.msk [vmem:[#allocation0] sm:$0x1] %vm33_vm5, %v32_v16  }
  0x7e   :  { %40 = vst.msk [vmem:[#allocation0] sm:$0x1] %vm39_vm6, %v38_v17  }
  0x80   :  { %v44_v18 = vpop.permute.xlu0 %43   ;;  %v50_v19 = vpop.permute.xlu1 %49  }
  0x81   :  { %46 = vst.msk [vmem:[#allocation0] sm:$0x1] %vm45_vm7, %v44_v18  }
  0x82   :  { %52 = vst.msk [vmem:[#allocation0] sm:$0x1] %vm51_vm8, %v50_v19  }
  0x84   :  { %v56_v20 = vpop.permute.xlu0 %55   ;;  %v62_v21 = vpop.permute.xlu1 %61  }
  0x85   :  { %58 = vst.msk [vmem:[#allocation0] sm:$0x1] %vm57_vm9, %v56_v20  }
  0x86   :  { %64 = vst.msk [vmem:[#allocation0] sm:$0x1] %vm63_vm10, %v62_v21  }
  0x88   :  { %v68_v22 = vpop.permute.xlu0 %67  }
  0x89   :  { %70 = vst.msk [vmem:[#allocation0] sm:$0x1] %vm69_vm11, %v68_v22  }
  0x90   :  { %v74_v23 = vld [vmem:[#allocation0] sm:$0x1] }
  0x91   :  { %76 = vst [vmem:[%s160_s1] sm:$0x1] %v74_v23 }

// kernel: _lambda_.1
= control target key start
LH: loop header
LB: loop body
LE: loop exit
PB: predicated region body
PF: predicated region fallthrough
CT: control target
= control target key end

     0   :  { %v2752_v0 = vmov 0.0|0.0   ;;  %vm2753_vm0 = vmmov 0   ;;  %v2754_v4 = vmov 0.0   ;;  %s2755_s3 = smov 112   ;;  %vm310_vm1 = vcmask 916480   ;;  %s2756_s26 = smov 96   ;;  %s3698_s1 = inlined_call_operand.vmem [shape: f32[2200,128], index: 1, kind: input, shape index: {}]   ;;  %s3699_s0 = inlined_call_operand.vmem [shape: f32[8,128], index: 0, kind: input, shape index: {}]   ;;  %s3700_s2 = inlined_call_operand.vmem [shape: f32[8,128], index: 2, kind: output, shape index: {}]  }
   0x1   :  { %2380 = vmatprep.subr.bf16.mxu0 %v2752_v0  ;;  %v12_v1 = vld [vmem:[%s3698_s1] sm:$0xff]  ;;  %v13_v2 = vld [vmem:[%s3698_s1 + $0x8] sm:$0xff]  ;;  %v14_v3 = vld [vmem:[%s3698_s1 + $0x10] sm:$0xff]  ;;  %1893 = vmatprep.mubr.msk.f32.mxu0 %vm2753_vm0, %v2754_v4  ;;  %vm680_vm2 = vcmask 654336   ;;  %vm1235_vm3 = vcmask 785408   ;;  %vm1504_vm4 = vcmask 523264  }
   0x2   :  { %v2381_v5 = vpack.c.bf16 %v13_v2, %v12_v1  ;;  %v15_v6 = vld [vmem:[%s3698_s1 + $0x18] sm:$0xff]  ;;  %2404 = vmatprep.subr.bf16.mxu1 %v2752_v0  ;;  %1928 = vmatprep.mubr.msk.f32.mxu1 %vm2753_vm0, %v2754_v4  ;;  %v16_v8 = vld [vmem:[%s3698_s1 + $0x20] sm:$0xff]  ;;  %v17_v9 = vld [vmem:[%s3698_s1 + $0x28] sm:$0xff] }
   0x3   :  { %v2384_v7 = vpack.c.bf16 %v15_v6, %v14_v3  ;;  %v103_v10 = vld [vmem:[%s3698_s1 + $0x88] sm:$0xff]  ;;  %v104_v11 = vld [vmem:[%s3698_s1 + $0x90] sm:$0xff]  ;;  %v2387_v12 = vpack.c.bf16 %v17_v9, %v16_v8  ;;  %v105_v14 = vld [vmem:[%s3698_s1 + $0x98] sm:$0xff] }
   0x4   :  { %2382 = vmatpush3.bf16.msra.mxu0 %v2381_v5  ;;  %v2405_v13 = vpack.c.bf16 %v104_v11, %v103_v10  ;;  %v106_v15 = vld [vmem:[%s3698_s1 + $0xa0] sm:$0xff]  ;;  %v18_v16 = vld [vmem:[%s3698_s1 + $0x30] sm:$0xff]  ;;  %v19_v17 = vld [vmem:[%s3698_s1 + $0x38] sm:$0xff] }
   0x5   :  { %2383 = vmatprep.subr.bf16.mxu0 %v2752_v0  ;;  %v2408_v18 = vpack.c.bf16 %v106_v15, %v105_v14  ;;  %v107_v19 = vld [vmem:[%s3698_s1 + $0xa8] sm:$0xff]  ;;  %v108_v20 = vld [vmem:[%s3698_s1 + $0xb0] sm:$0xff]  ;;  %v2390_v21 = vpack.c.bf16 %v19_v17, %v18_v16  ;;  %v20_v22 = vld [vmem:[%s3698_s1 + $0x40] sm:$0xff] }
   0x6   :  { %2406 = vmatpush3.bf16.msra.mxu1 %v2405_v13  ;;  %v21_v23 = vld [vmem:[%s3698_s1 + $0x48] sm:$0xff]  ;;  %v2411_v24 = vpack.c.bf16 %v108_v20, %v107_v19  ;;  %v109_v25 = vld [vmem:[%s3698_s1 + $0xb8] sm:$0xff]  ;;  %v110_v26 = vld [vmem:[%s3698_s1 + $0xc0] sm:$0xff] }
   0x7   :  { %2407 = vmatprep.subr.bf16.mxu1 %v2752_v0  ;;  %v2393_v27 = vpack.c.bf16 %v21_v23, %v20_v22  ;;  %v22_v28 = vld [vmem:[%s3698_s1 + $0x50] sm:$0xff]  ;;  %v23_v29 = vld [vmem:[%s3698_s1 + $0x58] sm:$0xff]  ;;  %v2414_v30 = vpack.c.bf16 %v110_v26, %v109_v25  ;;  %v111_v31 = vld [vmem:[%s3698_s1 + $0xc8] sm:$0xff] }
   0x8   :  { %2385 = vmatpush3.bf16.msra.mxu0 %v2384_v7  ;;  %v112_v32 = vld [vmem:[%s3698_s1 + $0xd0] sm:$0xff]  ;;  %v2396_v33 = vpack.c.bf16 %v23_v29, %v22_v28  ;;  %v24_v34 = vld [vmem:[%s3698_s1 + $0x60] sm:$0xff]  ;;  %v25_v35 = vld [vmem:[%s3698_s1 + $0x68] sm:$0xff] }
   0x9   :  { %2386 = vmatprep.subr.bf16.mxu0 %v2752_v0  ;;  %v2417_v36 = vpack.c.bf16 %v112_v32, %v111_v31  ;;  %v113_v37 = vld [vmem:[%s3698_s1 + $0xd8] sm:$0xff]  ;;  %v114_v38 = vld [vmem:[%s3698_s1 + $0xe0] sm:$0xff]  ;;  %v2399_v39 = vpack.c.bf16 %v25_v35, %v24_v34  ;;  %v26_v40 = vld [vmem:[%s3698_s1 + $0x70] sm:$0xff] }
   0xa   :  { %2409 = vmatpush3.bf16.msra.mxu1 %v2408_v18  ;;  %v27_v41 = vld [vmem:[%s3698_s1 + $0x78] sm:$0xff]  ;;  %v2420_v42 = vpack.c.bf16 %v114_v38, %v113_v37  ;;  %v115_v43 = vld [vmem:[%s3698_s1 + $0xe8] sm:$0xff]  ;;  %v116_v44 = vld [vmem:[%s3698_s1 + $0xf0] sm:$0xff] }
   0xb   :  { %2410 = vmatprep.subr.bf16.mxu1 %v2752_v0  ;;  %v2402_v45 = vpack.c.bf16 %v27_v41, %v26_v40  ;;  %v195_v46 = vld [vmem:[%s3698_s1 + $0x110] sm:$0xff]  ;;  %v196_v47 = vld [vmem:[%s3698_s1 + $0x118] sm:$0xff]  ;;  %v2423_v48 = vpack.c.bf16 %v116_v44, %v115_v43  ;;  %v11_v49 = vld [vmem:[%s3699_s0] sm:$0xff] }
   0xc   :  { %2388 = vmatpush3.bf16.msra.mxu0 %v2387_v12  ;;  %v2429_v50 = vpack.c.bf16 %v196_v47, %v195_v46  ;;  %v197_v51 = vld [vmem:[%s3698_s1 + $0x120] sm:$0xff]  ;;  %v198_v52 = vld [vmem:[%s3698_s1 + $0x128] sm:$0xff]  ;;  %v199_v54 = vld [vmem:[%s3698_s1 + $0x130] sm:$0xff] }
   0xd   :  { %2389 = vmatprep.subr.bf16.mxu0 %v2752_v0  ;;  %v2432_v53 = vpack.c.bf16 %v198_v52, %v197_v51  ;;  %v200_v55 = vld [vmem:[%s3698_s1 + $0x138] sm:$0xff]  ;;  %v201_v57 = vld [vmem:[%s3698_s1 + $0x140] sm:$0xff]  ;;  %v202_v58 = vld [vmem:[%s3698_s1 + $0x148] sm:$0xff] }
   0xe   :  { %2412 = vmatpush3.bf16.msra.mxu1 %v2411_v24  ;;  %v2435_v56 = vpack.c.bf16 %v200_v55, %v199_v54  ;;  %v2438_v59 = vpack.c.bf16 %v202_v58, %v201_v57  ;;  %v203_v60 = vld [vmem:[%s3698_s1 + $0x150] sm:$0xff]  ;;  %v204_v61 = vld [vmem:[%s3698_s1 + $0x158] sm:$0xff]  ;;  %v205_v63 = vld [vmem:[%s3698_s1 + $0x160] sm:$0xff] }
   0xf   :  { %2413 = vmatprep.subr.bf16.mxu1 %v2752_v0  ;;  %v2441_v62 = vpack.c.bf16 %v204_v61, %v203_v60  ;;  %v206_v1 = vld [vmem:[%s3698_s1 + $0x168] sm:$0xff]  ;;  %v207_v3 = vld [vmem:[%s3698_s1 + $0x170] sm:$0xff]  ;;  %v208_v5 = vld [vmem:[%s3698_s1 + $0x178] sm:$0xff] }
  0x10   :  { %2391 = vmatpush3.bf16.msra.mxu0 %v2390_v21  ;;  %v2444_v2 = vpack.c.bf16 %v206_v1, %v205_v63  ;;  %v2447_v6 = vpack.c.bf16 %v208_v5, %v207_v3  ;;  %v117_v7 = vld [vmem:[%s3698_s1 + $0xf8] sm:$0xff]  ;;  %v118_v8 = vld [vmem:[%s3698_s1 + $0x100] sm:$0xff]  ;;  %v210_v11 = vld [vmem:[%s3698_s1 + $0x188] sm:$0xff] }
  0x11   :  { %2392 = vmatprep.subr.bf16.mxu0 %v2752_v0  ;;  %v209_v9 = vld [vmem:[%s3698_s1 + $0x180] sm:$0xff]  ;;  %v2426_v10 = vpack.c.bf16 %v118_v8, %v117_v7  ;;  %v291_v13 = vld [vmem:[%s3698_s1 + $0x198] sm:$0xff]  ;;  %v293_v20 = vld [vmem:[%s3698_s1 + $0x1a8] sm:$0xff] }
  0x12   :  { %2415 = vmatpush3.bf16.msra.mxu1 %v2414_v30  ;;  %v2450_v12 = vpack.c.bf16 %v210_v11, %v209_v9  ;;  %v292_v14 = vld [vmem:[%s3698_s1 + $0x1a0] sm:$0xff]  ;;  %v294_v21 = vld [vmem:[%s3698_s1 + $0x1b0] sm:$0xff]  ;;  %v295_v23 = vld [vmem:[%s3698_s1 + $0x1b8] sm:$0xff] }
  0x13   :  { %2416 = vmatprep.subr.bf16.mxu1 %v2752_v0  ;;  %v1583_v15 = vld [vmem:[%s3698_s1 + $0x80] ss:$0 sm:$0xff]  ;;  %v2453_v17 = vpack.c.bf16 %v292_v14, %v291_v13  ;;  %v2456_v22 = vpack.c.bf16 %v294_v21, %v293_v20  ;;  %v297_v26 = vld [vmem:[%s3698_s1 + $0x1c8] sm:$0xff]  ;;  %v299_v29 = vld [vmem:[%s3698_s1 + $0x1d8] sm:$0xff] }
  0x14   :  { %2394 = vmatpush3.bf16.msra.mxu0 %v2393_v27  ;;  %v296_v24 = vld [vmem:[%s3698_s1 + $0x1c0] sm:$0xff]  ;;  %v298_v27 = vld [vmem:[%s3698_s1 + $0x1d0] sm:$0xff]  ;;  %v301_v32 = vld [vmem:[%s3698_s1 + $0x1e8] sm:$0xff] }
  0x15   :  { %2395 = vmatprep.subr.bf16.mxu0 %v2752_v0  ;;  %v2459_v25 = vpack.c.bf16 %v296_v24, %v295_v23  ;;  %v2462_v28 = vpack.c.bf16 %v298_v27, %v297_v26  ;;  %v300_v30 = vld [vmem:[%s3698_s1 + $0x1e0] sm:$0xff]  ;;  %v303_v35 = vld [vmem:[%s3698_s1 + $0x1f8] sm:$0xff]  ;;  %v1585_v38 = vld [vmem:[%s3698_s1 + $0x190] ss:$0 sm:$0xff] }
  0x16   :  { %2418 = vmatpush3.bf16.msra.mxu1 %v2417_v36  ;;  %v2465_v31 = vpack.c.bf16 %v300_v30, %v299_v29  ;;  %v304_v36 = vld [vmem:[%s3698_s1 + $0x200] sm:$0xff]  ;;  %v1584_v44 = vld [vmem:[%s3698_s1 + $0x108] ss:$0 sm:$0xff]  ;;  %v388_v58 = vld [vmem:[%s3698_s1 + $0x230] sm:$0xff] }
  0x17   :  { %2419 = vmatprep.subr.bf16.mxu1 %v2752_v0  ;;  %v2471_v37 = vpack.c.bf16 %v304_v36, %v303_v35  ;;  %v386_v55 = vld [vmem:[%s3698_s1 + $0x220] sm:$0xff]  ;;  %v392_v1 = vld [vmem:[%s3698_s1 + $0x250] sm:$0xff]  ;;  %v397_v9 = vld [vmem:[%s3698_s1 + $0x278] sm:$0xff] }
  0x18   :  { %2397 = vmatpush3.bf16.msra.mxu0 %v2396_v33  ;;  %v302_v33 = vld [vmem:[%s3698_s1 + $0x1f0] sm:$0xff]  ;;  %v390_v61 = vld [vmem:[%s3698_s1 + $0x240] sm:$0xff]  ;;  %v478_v11 = vld [vmem:[%s3698_s1 + $0x288] sm:$0xff] }
  0x19   :  { %2398 = vmatprep.subr.bf16.mxu0 %v2752_v0  ;;  %v2468_v34 = vpack.c.bf16 %v302_v33, %v301_v32  ;;  %v394_v5 = vld [vmem:[%s3698_s1 + $0x260] sm:$0xff]  ;;  %v396_v8 = vld [vmem:[%s3698_s1 + $0x270] sm:$0xff]  ;;  %v574_v21 = vld [vmem:[%s3698_s1 + $0x318] sm:$0xff] }
  0x1a   :  { %2421 = vmatpush3.bf16.msra.mxu1 %v2420_v42  ;;  %v571_v13 = vld [vmem:[%s3698_s1 + $0x300] sm:$0xff]  ;;  %v573_v20 = vld [vmem:[%s3698_s1 + $0x310] sm:$0xff]  ;;  %v482_v24 = vld [vmem:[%s3698_s1 + $0x2a8] sm:$0xff] }
  0x1b   :  { %2422 = vmatprep.subr.bf16.mxu1 %v2752_v0  ;;  %v2519_v23 = vpack.c.bf16 %v574_v21, %v573_v20  ;;  %v575_v26 = vld [vmem:[%s3698_s1 + $0x320] sm:$0xff]  ;;  %v576_v27 = vld [vmem:[%s3698_s1 + $0x328] sm:$0xff]  ;;  %v484_v30 = vld [vmem:[%s3698_s1 + $0x2b8] sm:$0xff] }
  0x1c   :  { %2400 = vmatpush3.bf16.msra.mxu0 %v2399_v39  ;;  %v2522_v29 = vpack.c.bf16 %v576_v27, %v575_v26  ;;  %v577_v32 = vld [vmem:[%s3698_s1 + $0x330] sm:$0xff]  ;;  %v578_v33 = vld [vmem:[%s3698_s1 + $0x338] sm:$0xff]  ;;  %v486_v36 = vld [vmem:[%s3698_s1 + $0x2c8] sm:$0xff] }
  0x1d   :  { %2401 = vmatprep.subr.bf16.mxu0 %v2752_v0  ;;  %v2525_v35 = vpack.c.bf16 %v578_v33, %v577_v32  ;;  %v761_v20 = vld [vmem:[%s3698_s1 + $0x438] sm:$0xff] }
  0x1e   :  { %2424 = vmatpush3.bf16.msra.mxu1 %v2423_v48  ;;  %v765_v27 = vld [vmem:[%s3698_s1 + $0x458] sm:$0xff] }
  0x1f   :  { %2425 = vmatprep.subr.bf16.mxu1 %v2752_v0 }
  0x20   :  { %2403 = vmatpush3.bf16.msra.mxu0 %v2402_v45 }
  0x21   :  { %2428 = vmatprep.subr.bf16.mxu0 %v2752_v0 }
  0x22   :  { %2427 = vmatpush3.bf16.msra.mxu1 %v2426_v10  ;;  %v2492_v10 = vpack.c.bf16 %v397_v9, %v396_v8  ;;  %v669_v8 = vld [vmem:[%s3698_s1 + $0x398] sm:$0xff]  ;;  %v670_v9 = vld [vmem:[%s3698_s1 + $0x3a0] sm:$0xff] }
  0x23   :  { %1894 = vmatmul.mubr.f32.vlgmr.msra.gmra.mrb[0].mxu0 %v11_v49  ;;  %2452 = vmatprep.subr.bf16.mxu1 %v2752_v0  ;;  %v384_v49 = vld [vmem:[%s3698_s1 + $0x210] sm:$0xff] }
  0x24   :  { %2430 = vmatpush3.bf16.msra.mxu0 %v2429_v50  ;;  %1963 = vmatprep.mubr.msk.f32.mxu0 %vm2753_vm0, %v2754_v4  ;;  %v385_v50 = vld [vmem:[%s3698_s1 + $0x218] sm:$0xff] }
  0x25   :  { %2431 = vmatprep.subr.bf16.mxu0 %v2752_v0 }
  0x28   :  { %2433 = vmatpush3.bf16.msra.mxu0 %v2432_v53  ;;  %v2474_v53 = vpack.c.bf16 %v385_v50, %v384_v49  ;;  %v491_v49 = vld [vmem:[%s3698_s1 + $0x2f0] sm:$0xff]  ;;  %v583_v50 = vld [vmem:[%s3698_s1 + $0x360] sm:$0xff] }
  0x29   :  { %2434 = vmatprep.subr.bf16.mxu0 %v2752_v0 }
  0x2c   :  { %2436 = vmatpush3.bf16.msra.mxu0 %v2435_v56  ;;  %v387_v56 = vld [vmem:[%s3698_s1 + $0x228] sm:$0xff] }
  0x2d   :  { %2437 = vmatprep.subr.bf16.mxu0 %v2752_v0  ;;  %v2477_v57 = vpack.c.bf16 %v387_v56, %v386_v55 }
  0x30   :  { %2439 = vmatpush3.bf16.msra.mxu0 %v2438_v59  ;;  %v389_v59 = vld [vmem:[%s3698_s1 + $0x238] sm:$0xff] }
  0x31   :  { %2440 = vmatprep.subr.bf16.mxu0 %v2752_v0  ;;  %v2480_v60 = vpack.c.bf16 %v389_v59, %v388_v58  ;;  %v1588_v58 = vld [vmem:[%s3698_s1 + $0x280] ss:$0 sm:$0xff] }
  0x34   :  { %2442 = vmatpush3.bf16.msra.mxu0 %v2441_v62  ;;  %v391_v62 = vld [vmem:[%s3698_s1 + $0x248] sm:$0xff] }
  0x35   :  { %2443 = vmatprep.subr.bf16.mxu0 %v2752_v0  ;;  %v2483_v63 = vpack.c.bf16 %v391_v62, %v390_v61 }
  0x38   :  { %2445 = vmatpush3.bf16.msra.mxu0 %v2444_v2  ;;  %v393_v2 = vld [vmem:[%s3698_s1 + $0x258] sm:$0xff] }
  0x39   :  { %2446 = vmatprep.subr.bf16.mxu0 %v2752_v0  ;;  %v2486_v3 = vpack.c.bf16 %v393_v2, %v392_v1  ;;  %v665_v1 = vld [vmem:[%s3698_s1 + $0x378] sm:$0xff]  ;;  %v666_v2 = vld [vmem:[%s3698_s1 + $0x380] sm:$0xff] }
  0x3c   :  { %2448 = vmatpush3.bf16.msra.mxu0 %v2447_v6  ;;  %v395_v6 = vld [vmem:[%s3698_s1 + $0x268] sm:$0xff] }
  0x3d   :  { %2449 = vmatprep.subr.bf16.mxu0 %v2752_v0  ;;  %v2489_v7 = vpack.c.bf16 %v395_v6, %v394_v5  ;;  %v667_v5 = vld [vmem:[%s3698_s1 + $0x388] sm:$0xff]  ;;  %v668_v6 = vld [vmem:[%s3698_s1 + $0x390] sm:$0xff] }
  0x40   :  { %2451 = vmatpush3.bf16.msra.mxu0 %v2450_v12  ;;  %v479_v12 = vld [vmem:[%s3698_s1 + $0x290] sm:$0xff] }
  0x41   :  { %2494 = vmatprep.subr.bf16.mxu0 %v2752_v0  ;;  %v2495_v14 = vpack.c.bf16 %v479_v12, %v478_v11  ;;  %v671_v11 = vld [vmem:[%s3698_s1 + $0x3a8] sm:$0xff]  ;;  %v672_v12 = vld [vmem:[%s3698_s1 + $0x3b0] sm:$0xff] }
  0xf6   :  { %v99_v16 = vpop.f32.mrb[0].mxu0 }
  0xf7   :  { %v2960_v18 = vadd.f32 %v1583_v15, %v99_v16  ;;  %v1895_v19 = vpop.f32.mrb[1].mxu0  ;;  %v572_v15 = vld [vmem:[%s3698_s1 + $0x308] sm:$0xff]  ;;  %v480_v16 = vld [vmem:[%s3698_s1 + $0x298] sm:$0xff] }
  0xf8   :  { %v2516_v19 = vpack.c.bf16 %v572_v15, %v571_v13  ;;  %v2546_v13 = vpack.c.bf16 %v672_v12, %v671_v11  ;;  %v674_v15 = vld [vmem:[%s3698_s1 + $0x3c0] sm:$0xff]  ;;  %v939_v12 = vld [vmem:[%s3698_s1 + $0x4f8] sm:$0xff] }
  0xf9   :  { %474 = vrot.lane.b32.xlu0 %v2960_v18, %s2755_s3  ;;  %1929 = vmatmul.mubr.f32.vlgmr.msra.gmra.mrb[0].mxu1 %v2960_v18 }
  0xfa   :  { %1964 = vmatmul.mubr.f32.vlgmr.msra.gmra.mrb[2].mxu0 %v2960_v18  ;;  %2454 = vmatpush3.bf16.msra.mxu1 %v2453_v17  ;;  %v481_v17 = vld [vmem:[%s3698_s1 + $0x2a0] sm:$0xff] }
  0xfb   :  { %2455 = vmatprep.subr.bf16.mxu1 %v2752_v0  ;;  %1994 = vmatprep.mubr.msk.f32.mxu1 %vm2753_vm0, %v2754_v4 }
  0xfc   :  { %2056 = vmatprep.mubr.msk.f32.mxu0 %vm2753_vm0, %v2754_v4  ;;  %2496 = vmatpush3.bf16.msra.mxu0 %v2495_v14  ;;  %v673_v14 = vld [vmem:[%s3698_s1 + $0x3b8] sm:$0xff] }
  0xfd   :  { %2497 = vmatprep.subr.bf16.mxu0 %v2752_v0 }
  0xfe   :  { %2457 = vmatpush3.bf16.msra.mxu1 %v2456_v22  ;;  %v2498_v22 = vpack.c.bf16 %v481_v17, %v480_v16  ;;  %v2549_v16 = vpack.c.bf16 %v674_v15, %v673_v14  ;;  %v759_v17 = vld [vmem:[%s3698_s1 + $0x428] sm:$0xff] }
  0xff   :  { %2458 = vmatprep.subr.bf16.mxu1 %v2752_v0  ;;  %v941_v14 = vld [vmem:[%s3698_s1 + $0x508] sm:$0xff] }
 0x100   :  { %2499 = vmatpush3.bf16.msra.mxu0 %v2498_v22  ;;  %v762_v22 = vld [vmem:[%s3698_s1 + $0x440] sm:$0xff] }
 0x101   :  { %2500 = vmatprep.subr.bf16.mxu0 %v2752_v0 }
 0x102   :  { %2460 = vmatpush3.bf16.msra.mxu1 %v2459_v25  ;;  %v483_v25 = vld [vmem:[%s3698_s1 + $0x2b0] sm:$0xff] }
 0x103   :  { %2461 = vmatprep.subr.bf16.mxu1 %v2752_v0 }
 0x106   :  { %2463 = vmatpush3.bf16.msra.mxu1 %v2462_v28  ;;  %v2501_v28 = vpack.c.bf16 %v483_v25, %v482_v24  ;;  %v763_v24 = vld [vmem:[%s3698_s1 + $0x448] sm:$0xff]  ;;  %v764_v25 = vld [vmem:[%s3698_s1 + $0x450] sm:$0xff] }
 0x107   :  { %2464 = vmatprep.subr.bf16.mxu1 %v2752_v0  ;;  %v2558_v26 = vpack.c.bf16 %v764_v25, %v763_v24  ;;  %v947_v25 = vld [vmem:[%s3698_s1 + $0x538] sm:$0xff] }
 0x108   :  { %2502 = vmatpush3.bf16.msra.mxu0 %v2501_v28  ;;  %v766_v28 = vld [vmem:[%s3698_s1 + $0x460] sm:$0xff] }
 0x109   :  { %2503 = vmatprep.subr.bf16.mxu0 %v2752_v0 }
 0x10a   :  { %2466 = vmatpush3.bf16.msra.mxu1 %v2465_v31  ;;  %v485_v31 = vld [vmem:[%s3698_s1 + $0x2c0] sm:$0xff] }
 0x10b   :  { %2467 = vmatprep.subr.bf16.mxu1 %v2752_v0 }
 0x10e   :  { %2469 = vmatpush3.bf16.msra.mxu1 %v2468_v34  ;;  %v2504_v34 = vpack.c.bf16 %v485_v31, %v484_v30  ;;  %v1592_v30 = vld [vmem:[%s3698_s1 + $0x370] ss:$0 sm:$0xff] }
 0x10f   :  { %2470 = vmatprep.subr.bf16.mxu1 %v2752_v0 }
 0x110   :  { %2505 = vmatpush3.bf16.msra.mxu0 %v2504_v34 }
 0x111   :  { %2506 = vmatprep.subr.bf16.mxu0 %v2752_v0 }
 0x112   :  { %2472 = vmatpush3.bf16.msra.mxu1 %v2471_v37  ;;  %v487_v37 = vld [vmem:[%s3698_s1 + $0x2d0] sm:$0xff] }
 0x113   :  { %2473 = vmatprep.subr.bf16.mxu1 %v2752_v0 }
 0x16b   :  { %v475_v62 = vpop.permute.xlu0 %474 }
 0x1cc   :  { %v190_v39 = vpop.f32.mrb[0].mxu1 }
 0x1cd   :  { %v282_v40 = vpop.f32.mrb[2].mxu0  ;;  %v1930_v41 = vpop.f32.mrb[1].mxu1  ;;  %v191_v46 = vadd.f32 %v1584_v44, %v190_v39  ;;  %v580_v39 = vld [vmem:[%s3698_s1 + $0x348] sm:$0xff]  ;;  %v581_v44 = vld [vmem:[%s3698_s1 + $0x350] sm:$0xff] }
 0x1ce   :  { %v283_v42 = vadd.f32 %v1585_v38, %v282_v40  ;;  %v1965_v43 = vpop.f32.mrb[3].mxu0  ;;  %v579_v38 = vld [vmem:[%s3698_s1 + $0x340] sm:$0xff]  ;;  %v2507_v40 = vpack.c.bf16 %v487_v37, %v486_v36  ;;  %v1590_v36 = vld [vmem:[%s3698_s1 + $0x2f8] ss:$0 sm:$0xff] }
 0x1cf   :  { %v2528_v41 = vpack.c.bf16 %v580_v39, %v579_v38  ;;  %v489_v43 = vld [vmem:[%s3698_s1 + $0x2e0] sm:$0xff] }
 0x1d0   :  { %v286_v45 = vmul.f32 0.5, %v283_v42  ;;  %v488_v42 = vld [vmem:[%s3698_s1 + $0x2d8] sm:$0xff]  ;;  %2508 = vmatpush3.bf16.msra.mxu0 %v2507_v40 }
 0x1d1   :  { %2509 = vmatprep.subr.bf16.mxu0 %v2752_v0 }
 0x1d2   :  { %2740 = vtanh.f32 %v286_v45  ;;  %v582_v45 = vld [vmem:[%s3698_s1 + $0x358] sm:$0xff] }
 0x1d3   :  { %2742 = vtanh.f32 %v191_v46  ;;  %v2510_v46 = vpack.c.bf16 %v489_v43, %v488_v42 }
 0x1d5   :  { %2511 = vmatpush3.bf16.msra.mxu0 %v2510_v46 }
 0x1d6   :  { %2512 = vmatprep.subr.bf16.mxu0 %v2752_v0 }
 0x1dc   :  { %v2741_v47 = vpop.eup %2740 }
 0x1dd   :  { %v288_v48 = vmul.f32 0.5, %v2741_v47  ;;  %v2743_v52 = vpop.eup %2742  ;;  %v2531_v47 = vpack.c.bf16 %v582_v45, %v581_v44  ;;  %v767_v44 = vld [vmem:[%s3698_s1 + $0x468] sm:$0xff]  ;;  %v768_v45 = vld [vmem:[%s3698_s1 + $0x470] sm:$0xff] }
 0x1de   :  { %v2564_v46 = vpack.c.bf16 %v768_v45, %v767_v44  ;;  %v1032_v44 = vld [vmem:[%s3698_s1 + $0x590] sm:$0xff]  ;;  %v1033_v45 = vld [vmem:[%s3698_s1 + $0x598] sm:$0xff] }
 0x1df   :  { %v289_v51 = vadd.f32 0.5, %v288_v48  ;;  %v490_v48 = vld [vmem:[%s3698_s1 + $0x2e8] sm:$0xff] }
 0x1e1   :  { %v290_v54 = vmul.f32 %v2743_v52, %v289_v51  ;;  %v2513_v51 = vpack.c.bf16 %v491_v49, %v490_v48  ;;  %v584_v52 = vld [vmem:[%s3698_s1 + $0x368] sm:$0xff]  ;;  %v849_v49 = vld [vmem:[%s3698_s1 + $0x490] sm:$0xff] }
 0x1e2   :  { %v848_v48 = vld [vmem:[%s3698_s1 + $0x488] sm:$0xff] }
 0x1e3   :  { %1995 = vmatmul.mubr.msk.f32.vlgmr.msra.gmra.mrb[2].mxu1 %vm310_vm1, %v290_v54  ;;  %2514 = vmatpush3.bf16.msra.mxu0 %v2513_v51  ;;  %v850_v51 = vld [vmem:[%s3698_s1 + $0x498] sm:$0xff] }
 0x1e4   :  { %2475 = vmatpush3.bf16.msra.mxu1 %v2474_v53  ;;  %2025 = vmatprep.mubr.msk.f32.mxu1 %vm2753_vm0, %v2754_v4  ;;  %v2534_v53 = vpack.c.bf16 %v584_v52, %v583_v50  ;;  %v2570_v52 = vpack.c.bf16 %v850_v51, %v849_v49  ;;  %v1037_v51 = vld [vmem:[%s3698_s1 + $0x5b8] sm:$0xff] }
 0x1e5   :  { %2476 = vmatprep.subr.bf16.mxu1 %v2752_v0  ;;  %2551 = vmatprep.subr.bf16.mxu0 %v2752_v0 }
 0x1e8   :  { %2478 = vmatpush3.bf16.msra.mxu1 %v2477_v57 }
 0x1e9   :  { %2479 = vmatprep.subr.bf16.mxu1 %v2752_v0 }
 0x1ec   :  { %2481 = vmatpush3.bf16.msra.mxu1 %v2480_v60 }
 0x1ed   :  { %2482 = vmatprep.subr.bf16.mxu1 %v2752_v0 }
 0x1f0   :  { %2484 = vmatpush3.bf16.msra.mxu1 %v2483_v63 }
 0x1f1   :  { %2485 = vmatprep.subr.bf16.mxu1 %v2752_v0 }
 0x1f4   :  { %2487 = vmatpush3.bf16.msra.mxu1 %v2486_v3  ;;  %v2537_v3 = vpack.c.bf16 %v666_v2, %v665_v1  ;;  %v859_v2 = vld [vmem:[%s3698_s1 + $0x4e0] sm:$0xff] }
 0x1f5   :  { %2488 = vmatprep.subr.bf16.mxu1 %v2752_v0 }
 0x1f8   :  { %2490 = vmatpush3.bf16.msra.mxu1 %v2489_v7  ;;  %v2540_v7 = vpack.c.bf16 %v668_v6, %v667_v5  ;;  %v1594_v6 = vld [vmem:[%s3698_s1 + $0x3c8] ss:$0 sm:$0xff] }
 0x1f9   :  { %2491 = vmatprep.subr.bf16.mxu1 %v2752_v0 }
 0x1fc   :  { %2493 = vmatpush3.bf16.msra.mxu1 %v2492_v10  ;;  %v2543_v10 = vpack.c.bf16 %v670_v9, %v669_v8 }
 0x1fd   :  { %2515 = vmatprep.subr.bf16.mxu1 %v2752_v0 }
 0x1ff   :  { %2026 = vmatmul.mubr.msk.f32.vlgmr.msra.gmra.mrb[4].mxu1 %vm310_vm1, %v290_v54  ;;  %v1586_v54 = vld [vmem:[%s3698_s1 + $0x208] ss:$0 sm:$0xff] }
 0x200   :  { %2087 = vmatprep.mubr.msk.f32.mxu1 %vm2753_vm0, %v2754_v4  ;;  %2517 = vmatpush3.bf16.msra.mxu1 %v2516_v19  ;;  %v760_v19 = vld [vmem:[%s3698_s1 + $0x430] sm:$0xff] }
 0x201   :  { %2518 = vmatprep.subr.bf16.mxu1 %v2752_v0  ;;  %v2552_v21 = vpack.c.bf16 %v760_v19, %v759_v17  ;;  %v943_v19 = vld [vmem:[%s3698_s1 + $0x518] sm:$0xff] }
 0x204   :  { %2520 = vmatpush3.bf16.msra.mxu1 %v2519_v23  ;;  %v2555_v23 = vpack.c.bf16 %v762_v22, %v761_v20  ;;  %v944_v20 = vld [vmem:[%s3698_s1 + $0x520] sm:$0xff]  ;;  %v945_v22 = vld [vmem:[%s3698_s1 + $0x528] sm:$0xff] }
 0x205   :  { %2521 = vmatprep.subr.bf16.mxu1 %v2752_v0 }
 0x208   :  { %2523 = vmatpush3.bf16.msra.mxu1 %v2522_v29  ;;  %v2561_v29 = vpack.c.bf16 %v766_v28, %v765_v27  ;;  %v949_v28 = vld [vmem:[%s3698_s1 + $0x548] sm:$0xff] }
 0x209   :  { %2524 = vmatprep.subr.bf16.mxu1 %v2752_v0 }
 0x20c   :  { %2526 = vmatpush3.bf16.msra.mxu1 %v2525_v35 }
 0x20d   :  { %2527 = vmatprep.subr.bf16.mxu1 %v2752_v0 }
 0x210   :  { %2529 = vmatpush3.bf16.msra.mxu1 %v2528_v41 }
 0x211   :  { %2530 = vmatprep.subr.bf16.mxu1 %v2752_v0 }
 0x214   :  { %2532 = vmatpush3.bf16.msra.mxu1 %v2531_v47  ;;  %v847_v47 = vld [vmem:[%s3698_s1 + $0x480] sm:$0xff] }
 0x215   :  { %2533 = vmatprep.subr.bf16.mxu1 %v2752_v0  ;;  %v2567_v50 = vpack.c.bf16 %v848_v48, %v847_v47  ;;  %v1034_v47 = vld [vmem:[%s3698_s1 + $0x5a0] sm:$0xff]  ;;  %v1035_v48 = vld [vmem:[%s3698_s1 + $0x5a8] sm:$0xff] }
 0x216   :  { %v2618_v49 = vpack.c.bf16 %v1035_v48, %v1034_v47  ;;  %v1228_v48 = vld [vmem:[%s3698_s1 + $0x6e0] sm:$0xff] }
 0x218   :  { %2535 = vmatpush3.bf16.msra.mxu1 %v2534_v53  ;;  %v851_v53 = vld [vmem:[%s3698_s1 + $0x4a0] sm:$0xff] }
 0x219   :  { %2536 = vmatprep.subr.bf16.mxu1 %v2752_v0 }
 0x2b6   :  { %v380_v55 = vpop.f32.mrb[2].mxu1 }
 0x2b7   :  { %v381_v56 = vadd.f32 %v1586_v54, %v380_v55  ;;  %v1996_v57 = vpop.f32.mrb[3].mxu1  ;;  %v852_v54 = vld [vmem:[%s3698_s1 + $0x4a8] sm:$0xff] }
 0x2b8   :  { %v2573_v55 = vpack.c.bf16 %v852_v54, %v851_v53  ;;  %v854_v57 = vld [vmem:[%s3698_s1 + $0x4b8] sm:$0xff]  ;;  %v1038_v53 = vld [vmem:[%s3698_s1 + $0x5c0] sm:$0xff]  ;;  %v1039_v54 = vld [vmem:[%s3698_s1 + $0x5c8] sm:$0xff] }
 0x2b9   :  { %755 = vrot.lane.b32.xlu0 %v381_v56, %s2756_s26  ;;  %v853_v56 = vld [vmem:[%s3698_s1 + $0x4b0] sm:$0xff] }
 0x2d2   :  { %v469_v59 = vpop.f32.mrb[4].mxu1 }
 0x2d3   :  { %v470_v60 = vadd.f32 %v1588_v58, %v469_v59  ;;  %v2027_v61 = vpop.f32.mrb[5].mxu1  ;;  %v2576_v58 = vpack.c.bf16 %v854_v57, %v853_v56  ;;  %v855_v59 = vld [vmem:[%s3698_s1 + $0x4c0] sm:$0xff]  ;;  %v1040_v56 = vld [vmem:[%s3698_s1 + $0x5d0] sm:$0xff]  ;;  %v1041_v57 = vld [vmem:[%s3698_s1 + $0x5d8] sm:$0xff] }
 0x2d5   :  { %v477_v63 = vadd.f32 %v475_v62, %v470_v60  ;;  %v856_v60 = vld [vmem:[%s3698_s1 + $0x4c8] sm:$0xff]  ;;  %v857_v62 = vld [vmem:[%s3698_s1 + $0x4d0] sm:$0xff] }
 0x2d6   :  { %v2579_v61 = vpack.c.bf16 %v856_v60, %v855_v59  ;;  %v1042_v59 = vld [vmem:[%s3698_s1 + $0x5e0] sm:$0xff]  ;;  %v1043_v60 = vld [vmem:[%s3698_s1 + $0x5e8] sm:$0xff] }
 0x2d7   :  { %2057 = vmatmul.mubr.msk.f32.vlgmr.msra.gmra.mrb[4].mxu0 %vm310_vm1, %v477_v63  ;;  %2088 = vmatmul.mubr.msk.f32.vlgmr.msra.gmra.mrb[6].mxu1 %vm310_vm1, %v477_v63  ;;  %v858_v63 = vld [vmem:[%s3698_s1 + $0x4d8] sm:$0xff] }
 0x2d8   :  { %2110 = vmatprep.mubr.msk.f32.mxu1 %vm2753_vm0, %v2754_v4  ;;  %2133 = vmatprep.mubr.msk.f32.mxu0 %vm2753_vm0, %v2754_v4  ;;  %v2582_v1 = vpack.c.bf16 %v858_v63, %v857_v62  ;;  %v1044_v62 = vld [vmem:[%s3698_s1 + $0x5f0] sm:$0xff]  ;;  %v1045_v63 = vld [vmem:[%s3698_s1 + $0x5f8] sm:$0xff] }
 0x2d9   :  { %2538 = vmatpush3.bf16.msra.mxu1 %v2537_v3  ;;  %2553 = vmatpush3.bf16.msra.mxu0 %v2552_v21  ;;  %v860_v3 = vld [vmem:[%s3698_s1 + $0x4e8] sm:$0xff]  ;;  %v2594_v21 = vpack.c.bf16 %v944_v20, %v943_v19  ;;  %v1128_v20 = vld [vmem:[%s3698_s1 + $0x638] sm:$0xff] }
 0x2da   :  { %2539 = vmatprep.subr.bf16.mxu1 %v2752_v0  ;;  %2554 = vmatprep.subr.bf16.mxu0 %v2752_v0  ;;  %v2585_v5 = vpack.c.bf16 %v860_v3, %v859_v2  ;;  %v1218_v2 = vld [vmem:[%s3698_s1 + $0x690] sm:$0xff]  ;;  %v1219_v3 = vld [vmem:[%s3698_s1 + $0x698] sm:$0xff] }
 0x2dd   :  { %2541 = vmatpush3.bf16.msra.mxu1 %v2540_v7  ;;  %2556 = vmatpush3.bf16.msra.mxu0 %v2555_v23  ;;  %v946_v23 = vld [vmem:[%s3698_s1 + $0x530] sm:$0xff] }
 0x2de   :  { %2542 = vmatprep.subr.bf16.mxu1 %v2752_v0  ;;  %2557 = vmatprep.subr.bf16.mxu0 %v2752_v0  ;;  %v2597_v24 = vpack.c.bf16 %v946_v23, %v945_v22  ;;  %v1130_v23 = vld [vmem:[%s3698_s1 + $0x648] sm:$0xff] }
 0x2e1   :  { %2544 = vmatpush3.bf16.msra.mxu1 %v2543_v10  ;;  %2559 = vmatpush3.bf16.msra.mxu0 %v2558_v26  ;;  %v948_v26 = vld [vmem:[%s3698_s1 + $0x540] sm:$0xff] }
 0x2e2   :  { %2545 = vmatprep.subr.bf16.mxu1 %v2752_v0  ;;  %2560 = vmatprep.subr.bf16.mxu0 %v2752_v0  ;;  %v2600_v27 = vpack.c.bf16 %v948_v26, %v947_v25  ;;  %v1132_v26 = vld [vmem:[%s3698_s1 + $0x658] sm:$0xff] }
 0x2e5   :  { %2547 = vmatpush3.bf16.msra.mxu1 %v2546_v13  ;;  %2562 = vmatpush3.bf16.msra.mxu0 %v2561_v29  ;;  %v940_v13 = vld [vmem:[%s3698_s1 + $0x500] sm:$0xff]  ;;  %v950_v29 = vld [vmem:[%s3698_s1 + $0x550] sm:$0xff] }
 0x2e6   :  { %2548 = vmatprep.subr.bf16.mxu1 %v2752_v0  ;;  %2563 = vmatprep.subr.bf16.mxu0 %v2752_v0  ;;  %v2588_v15 = vpack.c.bf16 %v940_v13, %v939_v12  ;;  %v1124_v13 = vld [vmem:[%s3698_s1 + $0x618] sm:$0xff] }
 0x2e9   :  { %2550 = vmatpush3.bf16.msra.mxu1 %v2549_v16  ;;  %2565 = vmatpush3.bf16.msra.mxu0 %v2564_v46  ;;  %v942_v16 = vld [vmem:[%s3698_s1 + $0x510] sm:$0xff]  ;;  %v2615_v46 = vpack.c.bf16 %v1033_v45, %v1032_v44 }
 0x2ea   :  { %2566 = vmatprep.subr.bf16.mxu1 %v2752_v0  ;;  %2587 = vmatprep.subr.bf16.mxu0 %v2752_v0  ;;  %v2591_v17 = vpack.c.bf16 %v942_v16, %v941_v14  ;;  %v1125_v14 = vld [vmem:[%s3698_s1 + $0x620] sm:$0xff]  ;;  %v1126_v16 = vld [vmem:[%s3698_s1 + $0x628] sm:$0xff]  ;;  %v1226_v45 = vld [vmem:[%s3698_s1 + $0x6d0] sm:$0xff] }
 0x32b   :  { %v756_v10 = vpop.permute.xlu0 %755 }
 0x3aa   :  { %v566_v31 = vpop.f32.mrb[4].mxu0  ;;  %v656_v32 = vpop.f32.mrb[6].mxu1 }
 0x3ab   :  { %v657_v33 = vadd.f32 %v1592_v30, %v656_v32  ;;  %v2058_v34 = vpop.f32.mrb[5].mxu0  ;;  %v2089_v35 = vpop.f32.mrb[7].mxu1  ;;  %v567_v38 = vadd.f32 %v1590_v36, %v566_v31  ;;  %v2603_v30 = vpack.c.bf16 %v950_v29, %v949_v28  ;;  %v951_v31 = vld [vmem:[%s3698_s1 + $0x558] sm:$0xff]  ;;  %v952_v32 = vld [vmem:[%s3698_s1 + $0x560] sm:$0xff]  ;;  %v1134_v29 = vld [vmem:[%s3698_s1 + $0x668] sm:$0xff] }
 0x3ac   :  { %v953_v34 = vld [vmem:[%s3698_s1 + $0x568] sm:$0xff]  ;;  %v954_v35 = vld [vmem:[%s3698_s1 + $0x570] sm:$0xff] }
 0x3ad   :  { %v660_v37 = vmul.f32 0.5, %v657_v33  ;;  %v2606_v33 = vpack.c.bf16 %v952_v32, %v951_v31  ;;  %v2609_v36 = vpack.c.bf16 %v954_v35, %v953_v34  ;;  %v1136_v32 = vld [vmem:[%s3698_s1 + $0x678] sm:$0xff] }
 0x3af   :  { %2744 = vtanh.f32 %v660_v37  ;;  %v1030_v37 = vld [vmem:[%s3698_s1 + $0x580] sm:$0xff] }
 0x3b0   :  { %2746 = vtanh.f32 %v567_v38  ;;  %v1031_v38 = vld [vmem:[%s3698_s1 + $0x588] sm:$0xff] }
 0x3b9   :  { %v2745_v39 = vpop.eup %2744 }
 0x3ba   :  { %v662_v40 = vmul.f32 0.5, %v2745_v39  ;;  %v2747_v42 = vpop.eup %2746  ;;  %v1596_v39 = vld [vmem:[%s3698_s1 + $0x478] ss:$0 sm:$0xff] }
 0x3bc   :  { %v663_v41 = vadd.f32 0.5, %v662_v40 }
 0x3be   :  { %v664_v43 = vmul.f32 %v2747_v42, %v663_v41  ;;  %v2612_v41 = vpack.c.bf16 %v1031_v38, %v1030_v37  ;;  %v1220_v37 = vld [vmem:[%s3698_s1 + $0x6a0] sm:$0xff]  ;;  %v1221_v38 = vld [vmem:[%s3698_s1 + $0x6a8] sm:$0xff] }
 0x3c0   :  { %2111 = vmatmul.mubr.msk.f32.vlgmr.msra.gmra.mrb[8].mxu1 %vm680_vm2, %v664_v43 }
 0x3c1   :  { %2164 = vmatprep.mubr.msk.f32.mxu1 %vm2753_vm0, %v2754_v4  ;;  %2568 = vmatpush3.bf16.msra.mxu1 %v2567_v50  ;;  %v1036_v50 = vld [vmem:[%s3698_s1 + $0x5b0] sm:$0xff] }
 0x3c2   :  { %2569 = vmatprep.subr.bf16.mxu1 %v2752_v0 }
 0x3c5   :  { %2571 = vmatpush3.bf16.msra.mxu1 %v2570_v52  ;;  %v2621_v52 = vpack.c.bf16 %v1037_v51, %v1036_v50  ;;  %v1309_v51 = vld [vmem:[%s3698_s1 + $0x760] sm:$0xff] }
 0x3c6   :  { %2572 = vmatprep.subr.bf16.mxu1 %v2752_v0 }
 0x3c9   :  { %2574 = vmatpush3.bf16.msra.mxu1 %v2573_v55  ;;  %v2624_v55 = vpack.c.bf16 %v1039_v54, %v1038_v53  ;;  %v1311_v53 = vld [vmem:[%s3698_s1 + $0x770] sm:$0xff] }
 0x3ca   :  { %2575 = vmatprep.subr.bf16.mxu1 %v2752_v0 }
 0x3cd   :  { %2577 = vmatpush3.bf16.msra.mxu1 %v2576_v58  ;;  %v2627_v58 = vpack.c.bf16 %v1041_v57, %v1040_v56  ;;  %v1313_v57 = vld [vmem:[%s3698_s1 + $0x780] sm:$0xff] }
 0x3ce   :  { %2578 = vmatprep.subr.bf16.mxu1 %v2752_v0 }
 0x3d1   :  { %2580 = vmatpush3.bf16.msra.mxu1 %v2579_v61  ;;  %v2630_v61 = vpack.c.bf16 %v1043_v60, %v1042_v59  ;;  %v1315_v60 = vld [vmem:[%s3698_s1 + $0x790] sm:$0xff] }
 0x3d2   :  { %2581 = vmatprep.subr.bf16.mxu1 %v2752_v0 }
 0x3d5   :  { %2583 = vmatpush3.bf16.msra.mxu1 %v2582_v1  ;;  %v2633_v1 = vpack.c.bf16 %v1045_v63, %v1044_v62  ;;  %v1317_v63 = vld [vmem:[%s3698_s1 + $0x7a0] sm:$0xff] }
 0x3d6   :  { %2584 = vmatprep.subr.bf16.mxu1 %v2752_v0 }
 0x3d9   :  { %2586 = vmatpush3.bf16.msra.mxu1 %v2585_v5  ;;  %v2660_v5 = vpack.c.bf16 %v1219_v3, %v1218_v2  ;;  %v1602_v3 = vld [vmem:[%s3698_s1 + $0x688] ss:$0 sm:$0xff] }
 0x3da   :  { %2611 = vmatprep.subr.bf16.mxu1 %v2752_v0 }
 0x493   :  { %v750_v7 = vpop.f32.mrb[8].mxu1 }
 0x494   :  { %v751_v8 = vadd.f32 %v1594_v6, %v750_v7  ;;  %v2112_v9 = vpop.f32.mrb[9].mxu1  ;;  %v1122_v6 = vld [vmem:[%s3698_s1 + $0x608] sm:$0xff]  ;;  %v1123_v7 = vld [vmem:[%s3698_s1 + $0x610] sm:$0xff] }
 0x496   :  { %v758_v11 = vadd.f32 %v756_v10, %v751_v8  ;;  %v1598_v8 = vld [vmem:[%s3698_s1 + $0x4f0] ss:$0 sm:$0xff]  ;;  %v2636_v10 = vpack.c.bf16 %v1123_v7, %v1122_v6 }
 0x498   :  { %2134 = vmatmul.mubr.msk.f32.vlgmr.msra.gmra.mrb[6].mxu0 %vm680_vm2, %v758_v11 }
 0x499   :  { %2199 = vmatprep.mubr.msk.f32.mxu0 %vm2753_vm0, %v2754_v4  ;;  %2589 = vmatpush3.bf16.msra.mxu0 %v2588_v15  ;;  %v2639_v15 = vpack.c.bf16 %v1125_v14, %v1124_v13 }
 0x49a   :  { %2590 = vmatprep.subr.bf16.mxu0 %v2752_v0 }
 0x49d   :  { %2592 = vmatpush3.bf16.msra.mxu0 %v2591_v17  ;;  %v1127_v17 = vld [vmem:[%s3698_s1 + $0x630] sm:$0xff] }
 0x49e   :  { %2593 = vmatprep.subr.bf16.mxu0 %v2752_v0  ;;  %v2642_v19 = vpack.c.bf16 %v1127_v17, %v1126_v16  ;;  %v1319_v16 = vld [vmem:[%s3698_s1 + $0x7b0] sm:$0xff]  ;;  %v1320_v17 = vld [vmem:[%s3698_s1 + $0x7b8] sm:$0xff] }
 0x4a1   :  { %2595 = vmatpush3.bf16.msra.mxu0 %v2594_v21  ;;  %v1129_v21 = vld [vmem:[%s3698_s1 + $0x640] sm:$0xff] }
 0x4a2   :  { %2596 = vmatprep.subr.bf16.mxu0 %v2752_v0  ;;  %v2645_v22 = vpack.c.bf16 %v1129_v21, %v1128_v20  ;;  %v1399_v20 = vld [vmem:[%s3698_s1 + $0x7c8] sm:$0xff]  ;;  %v1400_v21 = vld [vmem:[%s3698_s1 + $0x7d0] sm:$0xff] }
 0x4a5   :  { %2598 = vmatpush3.bf16.msra.mxu0 %v2597_v24  ;;  %v1131_v24 = vld [vmem:[%s3698_s1 + $0x650] sm:$0xff] }
 0x4a6   :  { %2599 = vmatprep.subr.bf16.mxu0 %v2752_v0  ;;  %v2648_v25 = vpack.c.bf16 %v1131_v24, %v1130_v23  ;;  %v2696_v24 = vpack.c.bf16 %v1400_v21, %v1399_v20 }
 0x4a9   :  { %2601 = vmatpush3.bf16.msra.mxu0 %v2600_v27  ;;  %v1133_v27 = vld [vmem:[%s3698_s1 + $0x660] sm:$0xff] }
 0x4aa   :  { %2602 = vmatprep.subr.bf16.mxu0 %v2752_v0  ;;  %v2651_v28 = vpack.c.bf16 %v1133_v27, %v1132_v26  ;;  %v1401_v27 = vld [vmem:[%s3698_s1 + $0x7d8] sm:$0xff] }
 0x4ad   :  { %2604 = vmatpush3.bf16.msra.mxu0 %v2603_v30  ;;  %v1135_v30 = vld [vmem:[%s3698_s1 + $0x670] sm:$0xff] }
 0x4ae   :  { %2605 = vmatprep.subr.bf16.mxu0 %v2752_v0  ;;  %v2654_v31 = vpack.c.bf16 %v1135_v30, %v1134_v29  ;;  %v1403_v30 = vld [vmem:[%s3698_s1 + $0x7e8] sm:$0xff] }
 0x4b1   :  { %2607 = vmatpush3.bf16.msra.mxu0 %v2606_v33  ;;  %v1137_v33 = vld [vmem:[%s3698_s1 + $0x680] sm:$0xff] }
 0x4b2   :  { %2608 = vmatprep.subr.bf16.mxu0 %v2752_v0  ;;  %v2657_v34 = vpack.c.bf16 %v1137_v33, %v1136_v32  ;;  %v1405_v33 = vld [vmem:[%s3698_s1 + $0x7f8] sm:$0xff] }
 0x4b5   :  { %2610 = vmatpush3.bf16.msra.mxu0 %v2609_v36 }
 0x4b6   :  { %2635 = vmatprep.subr.bf16.mxu0 %v2752_v0 }
 0x56b   :  { %v843_v40 = vpop.f32.mrb[6].mxu0 }
 0x56c   :  { %v844_v42 = vadd.f32 %v1596_v39, %v843_v40  ;;  %v2135_v43 = vpop.f32.mrb[7].mxu0  ;;  %v2663_v39 = vpack.c.bf16 %v1221_v38, %v1220_v37  ;;  %v1222_v40 = vld [vmem:[%s3698_s1 + $0x6b0] sm:$0xff]  ;;  %v1409_v38 = vld [vmem:[%s3698_s1 + $0x818] sm:$0xff] }
 0x56d   :  { %v1225_v43 = vld [vmem:[%s3698_s1 + $0x6c8] sm:$0xff] }
 0x56e   :  { %2165 = vmatmul.mubr.msk.f32.vlgmr.msra.gmra.mrb[10].mxu1 %vm310_vm1, %v844_v42  ;;  %v1224_v42 = vld [vmem:[%s3698_s1 + $0x6c0] sm:$0xff] }
 0x56f   :  { %2613 = vmatpush3.bf16.msra.mxu1 %v2612_v41  ;;  %2234 = vmatprep.mubr.msk.f32.mxu1 %vm2753_vm0, %v2754_v4  ;;  %v2669_v44 = vpack.c.bf16 %v1225_v43, %v1224_v42  ;;  %v1413_v43 = vld [vmem:[%s3698_s1 + $0x838] sm:$0xff] }
 0x570   :  { %2614 = vmatprep.subr.bf16.mxu1 %v2752_v0 }
 0x573   :  { %2616 = vmatpush3.bf16.msra.mxu1 %v2615_v46  ;;  %v1227_v46 = vld [vmem:[%s3698_s1 + $0x6d8] sm:$0xff] }
 0x574   :  { %2617 = vmatprep.subr.bf16.mxu1 %v2752_v0  ;;  %v2672_v47 = vpack.c.bf16 %v1227_v46, %v1226_v45  ;;  %v1491_v46 = vld [vmem:[%s3698_s1 + $0x850] sm:$0xff] }
 0x577   :  { %2619 = vmatpush3.bf16.msra.mxu1 %v2618_v49  ;;  %v1229_v49 = vld [vmem:[%s3698_s1 + $0x6e8] sm:$0xff] }
 0x578   :  { %2620 = vmatprep.subr.bf16.mxu1 %v2752_v0  ;;  %v2675_v50 = vpack.c.bf16 %v1229_v49, %v1228_v48  ;;  %v1493_v48 = vld [vmem:[%s3698_s1 + $0x860] sm:$0xff] }
 0x57b   :  { %2622 = vmatpush3.bf16.msra.mxu1 %v2621_v52  ;;  %v1310_v52 = vld [vmem:[%s3698_s1 + $0x768] sm:$0xff] }
 0x57c   :  { %2623 = vmatprep.subr.bf16.mxu1 %v2752_v0  ;;  %v2678_v54 = vpack.c.bf16 %v1310_v52, %v1309_v51  ;;  %v1495_v52 = vld [vmem:[%s3698_s1 + $0x870] sm:$0xff] }
 0x57f   :  { %2625 = vmatpush3.bf16.msra.mxu1 %v2624_v55  ;;  %v1312_v55 = vld [vmem:[%s3698_s1 + $0x778] sm:$0xff] }
 0x580   :  { %2626 = vmatprep.subr.bf16.mxu1 %v2752_v0  ;;  %v2681_v56 = vpack.c.bf16 %v1312_v55, %v1311_v53  ;;  %v1496_v53 = vld [vmem:[%s3698_s1 + $0x878] sm:$0xff]  ;;  %v1605_v55 = vld [vmem:[%s3698_s1 + $0x7c0] ss:$0 sm:$0xff] }
 0x583   :  { %2628 = vmatpush3.bf16.msra.mxu1 %v2627_v58  ;;  %v1314_v58 = vld [vmem:[%s3698_s1 + $0x788] sm:$0xff] }
 0x584   :  { %2629 = vmatprep.subr.bf16.mxu1 %v2752_v0  ;;  %v2684_v59 = vpack.c.bf16 %v1314_v58, %v1313_v57 }
 0x587   :  { %2631 = vmatpush3.bf16.msra.mxu1 %v2630_v61  ;;  %v1316_v61 = vld [vmem:[%s3698_s1 + $0x798] sm:$0xff] }
 0x588   :  { %2632 = vmatprep.subr.bf16.mxu1 %v2752_v0  ;;  %v2687_v62 = vpack.c.bf16 %v1316_v61, %v1315_v60  ;;  %v1498_v60 = vld [vmem:[%s3698_s1 + $0x888] sm:$0xff] }
 0x58b   :  { %2634 = vmatpush3.bf16.msra.mxu1 %v2633_v1  ;;  %v1318_v1 = vld [vmem:[%s3698_s1 + $0x7a8] sm:$0xff] }
 0x58c   :  { %2659 = vmatprep.subr.bf16.mxu1 %v2752_v0  ;;  %v2690_v2 = vpack.c.bf16 %v1318_v1, %v1317_v63 }
 0x58e   :  { %2235 = vmatmul.mubr.f32.vlgmr.msra.gmra.mrb[12].mxu1 %v2960_v18 }
 0x58f   :  { %2296 = vmatprep.mubr.msk.f32.mxu1 %vm2753_vm0, %v2754_v4  ;;  %2661 = vmatpush3.bf16.msra.mxu1 %v2660_v5 }
 0x590   :  { %2662 = vmatprep.subr.bf16.mxu1 %v2752_v0 }
 0x593   :  { %2664 = vmatpush3.bf16.msra.mxu1 %v2663_v39  ;;  %v1410_v39 = vld [vmem:[%s3698_s1 + $0x820] sm:$0xff] }
 0x594   :  { %2665 = vmatprep.subr.bf16.mxu1 %v2752_v0 }
 0x641   :  { %v935_v9 = vpop.f32.mrb[10].mxu1 }
 0x642   :  { %v936_v11 = vadd.f32 %v1598_v8, %v935_v9  ;;  %v2166_v12 = vpop.f32.mrb[11].mxu1  ;;  %v1601_v8 = vld [vmem:[%s3698_s1 + $0x600] ss:$0 sm:$0xff] }
 0x644   :  { %2200 = vmatmul.mubr.f32.vlgmr.msra.gmra.mrb[8].mxu0 %v936_v11 }
 0x645   :  { %2637 = vmatpush3.bf16.msra.mxu0 %v2636_v10  ;;  %2269 = vmatprep.mubr.msk.f32.mxu0 %vm2753_vm0, %v2754_v4 }
 0x646   :  { %2638 = vmatprep.subr.bf16.mxu0 %v2752_v0 }
 0x649   :  { %2640 = vmatpush3.bf16.msra.mxu0 %v2639_v15 }
 0x64a   :  { %2641 = vmatprep.subr.bf16.mxu0 %v2752_v0 }
 0x64d   :  { %2643 = vmatpush3.bf16.msra.mxu0 %v2642_v19  ;;  %v2693_v19 = vpack.c.bf16 %v1320_v17, %v1319_v16 }
 0x64e   :  { %2644 = vmatprep.subr.bf16.mxu0 %v2752_v0 }
 0x651   :  { %2646 = vmatpush3.bf16.msra.mxu0 %v2645_v22  ;;  %v1603_v22 = vld [vmem:[%s3698_s1 + $0x6f0] ss:$0 sm:$0xff] }
 0x652   :  { %2647 = vmatprep.subr.bf16.mxu0 %v2752_v0 }
 0x655   :  { %2649 = vmatpush3.bf16.msra.mxu0 %v2648_v25 }
 0x656   :  { %2650 = vmatprep.subr.bf16.mxu0 %v2752_v0 }
 0x659   :  { %2652 = vmatpush3.bf16.msra.mxu0 %v2651_v28  ;;  %v1402_v28 = vld [vmem:[%s3698_s1 + $0x7e0] sm:$0xff] }
 0x65a   :  { %2653 = vmatprep.subr.bf16.mxu0 %v2752_v0  ;;  %v2699_v29 = vpack.c.bf16 %v1402_v28, %v1401_v27 }
 0x65d   :  { %2655 = vmatpush3.bf16.msra.mxu0 %v2654_v31  ;;  %v1404_v31 = vld [vmem:[%s3698_s1 + $0x7f0] sm:$0xff] }
 0x65e   :  { %2656 = vmatprep.subr.bf16.mxu0 %v2752_v0  ;;  %v2702_v32 = vpack.c.bf16 %v1404_v31, %v1403_v30 }
 0x661   :  { %v1117_v35 = vpop.f32.mrb[12].mxu1  ;;  %2658 = vmatpush3.bf16.msra.mxu0 %v2657_v34 }
 0x662   :  { %v2236_v36 = vpop.f32.mrb[13].mxu1  ;;  %2677 = vmatprep.subr.bf16.mxu0 %v2752_v0  ;;  %v1118_v10 = vadd.f32 %v1601_v8, %v1117_v35  ;;  %v1407_v35 = vld [vmem:[%s3698_s1 + $0x808] sm:$0xff] }
 0x663   :  { %v1408_v36 = vld [vmem:[%s3698_s1 + $0x810] sm:$0xff] }
 0x664   :  { %2270 = vmatmul.mubr.f32.vlgmr.msra.gmra.mrb[10].mxu0 %v2960_v18  ;;  %v1223_v18 = vld [vmem:[%s3698_s1 + $0x6b8] sm:$0xff]  ;;  %v2708_v37 = vpack.c.bf16 %v1408_v36, %v1407_v35 }
 0x665   :  { %2323 = vmatprep.mubr.msk.f32.mxu0 %vm2753_vm0, %v2754_v4  ;;  %v2666_v41 = vpack.c.bf16 %v1223_v18, %v1222_v40  ;;  %2679 = vmatpush3.bf16.msra.mxu0 %v2678_v54  ;;  %v2711_v40 = vpack.c.bf16 %v1410_v39, %v1409_v38  ;;  %v1411_v18 = vld [vmem:[%s3698_s1 + $0x828] sm:$0xff]  ;;  %v2726_v54 = vpack.c.bf16 %v1496_v53, %v1495_v52 }
 0x666   :  { %2680 = vmatprep.subr.bf16.mxu0 %v2752_v0 }
 0x667   :  { %2667 = vmatpush3.bf16.msra.mxu1 %v2666_v41  ;;  %v1412_v41 = vld [vmem:[%s3698_s1 + $0x830] sm:$0xff] }
 0x668   :  { %2668 = vmatprep.subr.bf16.mxu1 %v2752_v0  ;;  %v2714_v42 = vpack.c.bf16 %v1412_v41, %v1411_v18 }
 0x669   :  { %2682 = vmatpush3.bf16.msra.mxu0 %v2681_v56 }
 0x66a   :  { %2683 = vmatprep.subr.bf16.mxu0 %v2752_v0 }
 0x66b   :  { %2670 = vmatpush3.bf16.msra.mxu1 %v2669_v44  ;;  %v1414_v44 = vld [vmem:[%s3698_s1 + $0x840] sm:$0xff] }
 0x66c   :  { %2671 = vmatprep.subr.bf16.mxu1 %v2752_v0  ;;  %v2717_v45 = vpack.c.bf16 %v1414_v44, %v1413_v43 }
 0x66d   :  { %2685 = vmatpush3.bf16.msra.mxu0 %v2684_v59  ;;  %v1497_v59 = vld [vmem:[%s3698_s1 + $0x880] sm:$0xff] }
 0x66e   :  { %2686 = vmatprep.subr.bf16.mxu0 %v2752_v0  ;;  %v2729_v61 = vpack.c.bf16 %v1498_v60, %v1497_v59 }
 0x66f   :  { %2673 = vmatpush3.bf16.msra.mxu1 %v2672_v47  ;;  %v1492_v47 = vld [vmem:[%s3698_s1 + $0x858] sm:$0xff] }
 0x670   :  { %2674 = vmatprep.subr.bf16.mxu1 %v2752_v0  ;;  %v2720_v49 = vpack.c.bf16 %v1492_v47, %v1491_v46 }
 0x671   :  { %2688 = vmatpush3.bf16.msra.mxu0 %v2687_v62  ;;  %v1607_v62 = vld [vmem:[%s3698_s1 + $0x848] ss:$0 sm:$0xff] }
 0x672   :  { %2689 = vmatprep.subr.bf16.mxu0 %v2752_v0 }
 0x673   :  { %2676 = vmatpush3.bf16.msra.mxu1 %v2675_v50  ;;  %v1494_v50 = vld [vmem:[%s3698_s1 + $0x868] sm:$0xff] }
 0x674   :  { %2719 = vmatprep.subr.bf16.mxu1 %v2752_v0  ;;  %v2723_v51 = vpack.c.bf16 %v1494_v50, %v1493_v48 }
 0x675   :  { %2691 = vmatpush3.bf16.msra.mxu0 %v2690_v2 }
 0x676   :  { %2692 = vmatprep.subr.bf16.mxu0 %v2752_v0 }
 0x679   :  { %2694 = vmatpush3.bf16.msra.mxu0 %v2693_v19 }
 0x67a   :  { %2695 = vmatprep.subr.bf16.mxu0 %v2752_v0 }
 0x737   :  { %v1209_v5 = vpop.f32.mrb[10].mxu0 }
 0x738   :  { %v1210_v6 = vadd.f32 %v1602_v3, %v1209_v5  ;;  %v2271_v7 = vpop.f32.mrb[11].mxu0  ;;  %v1608_v5 = vld [vmem:[%s3698_s1 + $0x890] ss:$0 sm:$0xff] }
 0x73a   :  { %v1213_v9 = vmul.f32 0.5, %v1210_v6 }
 0x73c   :  { %2748 = vtanh.f32 %v1213_v9 }
 0x73d   :  { %2750 = vtanh.f32 %v1118_v10 }
 0x746   :  { %v2749_v11 = vpop.eup %2748 }
 0x747   :  { %v1215_v12 = vmul.f32 0.5, %v2749_v11  ;;  %v2751_v14 = vpop.eup %2750 }
 0x749   :  { %v1216_v13 = vadd.f32 0.5, %v1215_v12 }
 0x74b   :  { %v1217_v15 = vmul.f32 %v2751_v14, %v1216_v13 }
 0x74d   :  { %2297 = vmatmul.mubr.msk.f32.vlgmr.msra.gmra.mrb[14].mxu1 %vm1235_vm3, %v1217_v15 }
 0x74e   :  { %2377 = vmatprep.mubr.msk.f32.mxu1 %vm2753_vm0, %v2754_v4  ;;  %2721 = vmatpush3.bf16.msra.mxu1 %v2720_v49 }
 0x74f   :  { %2722 = vmatprep.subr.bf16.mxu1 %v2752_v0 }
 0x752   :  { %2724 = vmatpush3.bf16.msra.mxu1 %v2723_v51 }
 0x753   :  { %2725 = vmatprep.subr.bf16.mxu1 %v2752_v0 }
 0x756   :  { %2727 = vmatpush3.bf16.msra.mxu1 %v2726_v54 }
 0x757   :  { %2728 = vmatprep.subr.bf16.mxu1 %v2752_v0 }
 0x75a   :  { %2730 = vmatpush3.bf16.msra.mxu1 %v2729_v61 }
 0x820   :  { %v1305_v23 = vpop.f32.mrb[14].mxu1 }
 0x821   :  { %v1306_v25 = vadd.f32 %v1603_v22, %v1305_v23  ;;  %v2298_v26 = vpop.f32.mrb[15].mxu1 }
 0x823   :  { %2324 = vmatmul.mubr.msk.f32.vlgmr.msra.gmra.mrb[12].mxu0 %vm1235_vm3, %v1306_v25 }
 0x824   :  { %2697 = vmatpush3.bf16.msra.mxu0 %v2696_v24  ;;  %2358 = vmatprep.mubr.msk.f32.mxu0 %vm2753_vm0, %v2754_v4  ;;  %v1406_v4 = vld [vmem:[%s3698_s1 + $0x800] sm:$0xff] }
 0x825   :  { %2698 = vmatprep.subr.bf16.mxu0 %v2752_v0  ;;  %v2705_v34 = vpack.c.bf16 %v1406_v4, %v1405_v33 }
 0x828   :  { %2700 = vmatpush3.bf16.msra.mxu0 %v2699_v29 }
 0x829   :  { %2701 = vmatprep.subr.bf16.mxu0 %v2752_v0 }
 0x82c   :  { %2703 = vmatpush3.bf16.msra.mxu0 %v2702_v32 }
 0x82d   :  { %2704 = vmatprep.subr.bf16.mxu0 %v2752_v0 }
 0x830   :  { %2706 = vmatpush3.bf16.msra.mxu0 %v2705_v34 }
 0x831   :  { %2707 = vmatprep.subr.bf16.mxu0 %v2752_v0 }
 0x834   :  { %2709 = vmatpush3.bf16.msra.mxu0 %v2708_v37 }
 0x835   :  { %2710 = vmatprep.subr.bf16.mxu0 %v2752_v0 }
 0x838   :  { %2712 = vmatpush3.bf16.msra.mxu0 %v2711_v40 }
 0x839   :  { %2713 = vmatprep.subr.bf16.mxu0 %v2752_v0 }
 0x83c   :  { %2715 = vmatpush3.bf16.msra.mxu0 %v2714_v42 }
 0x83d   :  { %2716 = vmatprep.subr.bf16.mxu0 %v2752_v0  ;;  %v1600_v0 = vld [vmem:[%s3698_s1 + $0x578] ss:$0 sm:$0xff] }
 0x83e   :  { %v2731_v63 = vadd.f32 %v1607_v62, %v1600_v0 }
 0x840   :  { %2718 = vmatpush3.bf16.msra.mxu0 %v2717_v45 }
 0x8f6   :  { %v1395_v56 = vpop.f32.mrb[12].mxu0 }
 0x8f7   :  { %v1396_v57 = vadd.f32 %v1605_v55, %v1395_v56  ;;  %v2325_v58 = vpop.f32.mrb[13].mxu0 }
 0x8f9   :  { %2359 = vmatmul.mubr.f32.vlgmr.msra.gmra.mrb[8].mxu0 %v1396_v57 }
 0x9cc   :  { %v1486_v1 = vpop.f32.mrb[8].mxu0 }
 0x9cd   :  { %v2732_v2 = vadd.f32 %v2731_v63, %v1486_v1  ;;  %v2360_v3 = vpop.f32.mrb[9].mxu0 }
 0x9cf   :  { %2378 = vmatmul.mubr.msk.f32.vlgmr.msra.gmra.mrb[16].mxu1 %vm1504_vm4, %v2732_v2 }
 0xaa2   :  { %v1574_v6 = vpop.f32.mrb[16].mxu1 }
 0xaa3   :  { %v1575_v7 = vadd.f32 %v1608_v5, %v1574_v6  ;;  %v2379_v8 = vpop.f32.mrb[17].mxu1 }
 0xaa5   :  { %1578 = vst [vmem:[%s3700_s2] sm:$0xff] %v1575_v7 }

</bundles_post_ra>
